<compile_context>
chip_gen: v7x
topology: tpu7x:2x2x1
jax: 0.10.0
libtpu: 0.0.40
codegen_flags: <defaults>
</compile_context>

<pallas_src>
import numpy as np
import jax
import jax.numpy as jnp
from jax.experimental import pallas as pl
from jax.experimental.pallas import tpu as pltpu

_EPS = 1e-5


# ---------------------------------------------------------------------------
# The fused Pallas kernel: one image per grid step.
# ---------------------------------------------------------------------------
def _local_cnn_kernel(p1_ref, w1f_ref, b1f_ref,
                      g2s_ref, w2f_ref, b2f_ref,
                      wl1w_ref, pw_ref, bl1f_ref,
                      wl2p_ref, bl2p_ref, o_ref):
    f32 = jnp.float32
    cdt = p1_ref.dtype                      # MXU feed dtype (bf16 or f32)

    # --- conv1 + BN1 + ReLU + 2x2/2 maxpool ---------------------------------
    # One (224,108)@(108,16) matmul; maxpool = elementwise max over the four
    # static, 8-aligned 56-row tap slabs (merged 4 matmuls -> 1).
    y1 = jnp.dot(p1_ref[0], w1f_ref[...], preferred_element_type=f32) + b1f_ref[...]
    y1 = jnp.maximum(y1, 0.0)
    y2 = jnp.maximum(jnp.maximum(y1[0:56], y1[56:112]),
                     jnp.maximum(y1[112:168], y1[168:224]))          # (56,16)

    # --- conv2 + BN2 + ReLU ---------------------------------------------------
    # One stacked gather matmul (288,56)@(56,16) (merged 9 -> 1), then 9
    # accumulated per-tap (32,16)@(16,16) weight matmuls on static 32-row slices.
    rows = jnp.dot(g2s_ref[...], y2.astype(cdt),
                   preferred_element_type=f32).astype(cdt)           # (288,16)
    w2f = w2f_ref[...]                                               # (9,16,16)
    acc = jnp.zeros((32, 16), f32)
    for t in range(9):                                               # static unroll
        acc = acc + jnp.dot(rows[t * 32:(t + 1) * 32], w2f[t],
                            preferred_element_type=f32)
    y3 = jnp.maximum(acc + b2f_ref[...], 0.0)                        # (32,16)

    # --- ceil-mode avgpool + NCHW flatten + linear1 + BN3 + ReLU --------------
    # T[p, k*128+o] = sum_c y3[p,c] * wl1[c*9+k, o] * s3[o]  -- one lane-dense
    # (32,16)@(16,1152) matmul -- then the pool weights (1/valid-count, zero on
    # padded rows 25..31) are applied elementwise and reduced:
    #   h[o] = sum_{p,k} pz[k,p] * T[p, k*128+o]
    t_wide = jnp.dot(y3.astype(cdt), wl1w_ref[...],
                     preferred_element_type=f32)                     # (32,1152)
    pw = pw_ref[...]                                                 # (32,1152) f32
    h = jnp.zeros((1, 128), f32)
    for k in range(9):                                               # static unroll
        lo, hi = k * 128, (k + 1) * 128
        h = h + jnp.sum(t_wide[:, lo:hi] * pw[:, lo:hi], axis=0, keepdims=True)
    h = jnp.maximum(h + bl1f_ref[...], 0.0)                          # (1,128)

    # --- linear2 (output padded to 256 lanes for a lane-dense store) ----------
    out = jnp.dot(h.astype(cdt), wl2p_ref[...],
                  preferred_element_type=f32) + bl2p_ref[...]        # (1,256)
    o_ref[0] = out.astype(o_ref.dtype)


# ---------------------------------------------------------------------------
# Constant folding (BN fold, per-image gather / pool matrices) -- trace time.
# ---------------------------------------------------------------------------
def _fold_constants(params, compute_dtype):
    f32 = jnp.float32

    def bn_fold(g, be, rm, rv):
        s = g / jnp.sqrt(rv + _EPS)
        return s, be - rm * s

    s1, t1 = bn_fold(params["g1"], params["be1"], params["rm1"], params["rv1"])
    w1f = jnp.transpose(params["w1"], (2, 3, 1, 0)).reshape(108, 16) * s1[None, :]
    b1f = (params["b1"] * s1 + t1).reshape(1, 16)

    s2, t2 = bn_fold(params["g2"], params["be2"], params["rm2"], params["rv2"])
    w2f = jnp.transpose(params["w2"], (2, 3, 1, 0)).reshape(9, 16, 16) * s2[None, None, :]
    b2f = (params["b2"] * s2 + t2).reshape(1, 16)

    s3, t3 = bn_fold(params["g3"], params["be3"], params["rm3"], params["rv3"])
    # NCHW flatten: feature f = c*9 + k (k = oh*3 + ow).  Stack linear1 per
    # pooled position along lanes: WL1_wide[c, k*128 + o] = wl1[c*9+k, o]*s3[o].
    wl1w = (params["wl1"].reshape(16, 9, 128) * s3[None, None, :]).reshape(16, 1152)
    bl1f = (params["bl1"] * s3 + t3).reshape(1, 128)

    # linear2 padded to 256 output lanes (sliced back in the wrapper).
    wl2p = jnp.pad(params["wl2"], ((0, 0), (0, 120)))                # (128,256)
    bl2p = jnp.pad(params["bl2"], (0, 120)).reshape(1, 256)

    # conv2 im2col gather, per image, all 9 taps stacked along rows: (288,56).
    # Row t*32 + (oh*5+ow) picks pooled-map position (oh+dh, ow+dw); rows for
    # padded conv2 positions (25..31 per tap) stay all-zero.
    g2s = np.zeros((288, 56), np.float32)
    for dh in range(3):
        for dw in range(3):
            t = dh * 3 + dw
            for oh in range(5):
                for ow in range(5):
                    g2s[t * 32 + oh * 5 + ow, (oh + dh) * 7 + (ow + dw)] = 1.0

    # Ceil-mode avgpool weights, broadcast across linear1's per-position lane
    # blocks: PW[p, k*128 + o] = 1/valid_count if y3 row p lies in pooled
    # window k, else 0 (padded rows 25..31 stay 0).
    pw = np.zeros((32, 9 * 128), np.float32)
    for oh in range(3):
        for ow in range(3):
            k = oh * 3 + ow
            hs = [h for h in (2 * oh, 2 * oh + 1) if h < 5]
            ws = [w for w in (2 * ow, 2 * ow + 1) if w < 5]
            inv = 1.0 / float(len(hs) * len(ws))
            for h in hs:
                for w in ws:
                    pw[h * 5 + w, k * 128:(k + 1) * 128] = inv

    cdt = compute_dtype
    return dict(
        w1f=w1f.astype(cdt), b1f=b1f.astype(f32),
        g2s=jnp.asarray(g2s, cdt), w2f=w2f.astype(cdt), b2f=b2f.astype(f32),
        wl1w=wl1w.astype(cdt), pw=jnp.asarray(pw, f32), bl1f=bl1f.astype(f32),
        wl2p=wl2p.astype(cdt), bl2p=bl2p.astype(f32))


def _conv1_patches(x_nhwc, compute_dtype):
    """Per-image conv1 (k=6, s=2) im2col, 2x2-maxpool-tap-major.

    Returns (n, 224, 108): within image b, row t*56 + (oh*7 + ow) for tap
    t = dh*2 + dw holds the conv1 patch at output position (2*oh+dh, 2*ow+dw),
    features ordered (kh, kw, cin).  Rows 49..55 of each tap block are zero
    padding and are never read downstream.
    """
    n = x_nhwc.shape[0]
    cols = []
    for kh in range(6):
        for kw in range(6):
            cols.append(x_nhwc[:, kh:kh + 27:2, kw:kw + 27:2, :])
    p4 = jnp.concatenate(cols, axis=-1)                              # (n,14,14,108)
    slabs = []
    for dh in range(2):
        for dw in range(2):
            s = p4[:, dh::2, dw::2, :].reshape(n, 49, 108)
            slabs.append(jnp.pad(s, ((0, 0), (0, 7), (0, 0))))
    return jnp.concatenate(slabs, axis=1).astype(compute_dtype)      # (n,224,108)


# ---------------------------------------------------------------------------
# Public forward: single pallas_call, grid over the batch.
# ---------------------------------------------------------------------------
def local_cnn_forward_pallas(params, x_nchw, *, use_bf16=True):
    n = x_nchw.shape[0]
    cdt = jnp.bfloat16 if use_bf16 else jnp.float32
    x = jnp.transpose(x_nchw, (0, 2, 3, 1)).astype(jnp.float32)      # NCHW -> NHWC
    c = _fold_constants(params, cdt)
    p1 = _conv1_patches(x, cdt)

    operands = (p1, c["w1f"], c["b1f"], c["g2s"], c["w2f"], c["b2f"],
                c["wl1w"], c["pw"], c["bl1f"], c["wl2p"], c["bl2p"])

    def const_map(ndim):
        return lambda i: (0,) * ndim

    in_specs = [pl.BlockSpec((1,) + p1.shape[1:], lambda i: (i, 0, 0))]
    in_specs += [pl.BlockSpec(op.shape, const_map(op.ndim)) for op in operands[1:]]

    out = pl.pallas_call(
        _local_cnn_kernel,
        grid=(n,),
        in_specs=in_specs,
        out_specs=pl.BlockSpec((1, 1, 256), lambda i: (i, 0, 0)),
        out_shape=jax.ShapeDtypeStruct((n, 1, 256), jnp.float32),
        compiler_params=pltpu.CompilerParams(
            dimension_semantics=("parallel",)),
    )(*operands)
    # TODO(synk): with a per-image grid the output store is 1 sublane per step;
    # at large batch, tile >=8 images per grid step for sublane-dense stores.
    return out.reshape(n, 256)[:, :136]


# ---------------------------------------------------------------------------
# Pure-jnp reference (straight translation of the PyTorch module, eval-mode BN
# with explicit running statistics).
# ---------------------------------------------------------------------------
def _im2col(x_nhwc, kh, kw, stride):
    n, h, w, c = x_nhwc.shape
    oh = (h - kh) // stride + 1
    ow = (w - kw) // stride + 1
    cols = []
    for i in range(kh):
        for j in range(kw):
            cols.append(x_nhwc[:, i:i + stride * (oh - 1) + 1:stride,
                               j:j + stride * (ow - 1) + 1:stride, :])
    p = jnp.concatenate(cols, axis=-1)
    return p.reshape(n * oh * ow, kh * kw * c), oh, ow


def _pool_windows(x_nhwc, k, stride, pad_value):
    n, h, w, c = x_nhwc.shape
    oh = (h - k + stride - 1) // stride + 1
    ow = (w - k + stride - 1) // stride + 1
    ph = (oh - 1) * stride + k
    pw = (ow - 1) * stride + k
    xp = jnp.pad(x_nhwc, ((0, 0), (0, ph - h), (0, pw - w), (0, 0)),
                 constant_values=pad_value)
    slabs = []
    for dh in range(k):
        for dw in range(k):
            slabs.append(xp[:, dh:dh + stride * (oh - 1) + 1:stride,
                            dw:dw + stride * (ow - 1) + 1:stride, :])
    stacked = jnp.stack(slabs, axis=0).reshape(k * k, n * oh * ow, c)
    rh = np.minimum(np.arange(oh) * stride + k, h) - np.arange(oh) * stride
    rw = np.minimum(np.arange(ow) * stride + k, w) - np.arange(ow) * stride
    counts = np.outer(rh, rw).astype(np.float32).reshape(1, oh * ow)
    counts = np.tile(counts, (n, 1)).reshape(n * oh * ow, 1)
    return stacked, jnp.asarray(counts), oh, ow


def local_cnn_reference(params, x_nchw):
    x = jnp.transpose(x_nchw, (0, 2, 3, 1)).astype(jnp.float32)
    n = x.shape[0]

    def bn(y, g, be, rm, rv):
        return (y - rm) / jnp.sqrt(rv + _EPS) * g + be

    p1, oh1, ow1 = _im2col(x, 6, 6, 2)
    w1m = jnp.transpose(params["w1"], (2, 3, 1, 0)).reshape(108, 16)
    y1 = p1 @ w1m + params["b1"][None, :]
    y1 = jnp.maximum(bn(y1, params["g1"], params["be1"],
                        params["rm1"], params["rv1"]), 0.0).reshape(n, oh1, ow1, 16)

    st, _, oh2, ow2 = _pool_windows(y1, 2, 2, -jnp.inf)
    y2 = jnp.max(st, axis=0).reshape(n, oh2, ow2, 16)

    p2, oh3, ow3 = _im2col(y2, 3, 3, 1)
    w2m = jnp.transpose(params["w2"], (2, 3, 1, 0)).reshape(144, 16)
    y3 = p2 @ w2m + params["b2"][None, :]
    y3 = jnp.maximum(bn(y3, params["g2"], params["be2"],
                        params["rm2"], params["rv2"]), 0.0).reshape(n, oh3, ow3, 16)

    st2, cnt2, oh4, ow4 = _pool_windows(y3, 2, 2, 0.0)
    y4 = (jnp.sum(st2, axis=0) / cnt2).reshape(n, oh4, ow4, 16)

    flat = jnp.transpose(y4, (0, 3, 1, 2)).reshape(n, 16 * oh4 * ow4)
    y5 = flat @ params["wl1"] + params["bl1"][None, :]
    y5 = jnp.maximum(bn(y5, params["g3"], params["be3"],
                        params["rm3"], params["rv3"]), 0.0)
    return y5 @ params["wl2"] + params["bl2"][None, :]


# ---------------------------------------------------------------------------
# Parameters (deterministic synthetic init, PyTorch-layout conv weights,
# non-trivial BN running statistics so the eval-mode fold is actually tested).
# ---------------------------------------------------------------------------
def init_params(key):
    ks = jax.random.split(key, 20)

    def unif(k, shape, fan_in):
        b = 1.0 / np.sqrt(fan_in)
        return jax.random.uniform(k, shape, jnp.float32, -b, b)

    p = {}
    p["w1"] = unif(ks[0], (16, 3, 6, 6), 3 * 6 * 6)       # (Cout, Cin, KH, KW)
    p["b1"] = unif(ks[1], (16,), 3 * 6 * 6)
    p["g1"] = jax.random.uniform(ks[2], (16,), jnp.float32, 0.5, 1.5)
    p["be1"] = unif(ks[3], (16,), 16)
    p["rm1"] = 0.1 * jax.random.normal(ks[14], (16,), jnp.float32)
    p["rv1"] = jax.random.uniform(ks[15], (16,), jnp.float32, 0.5, 1.5)

    p["w2"] = unif(ks[4], (16, 16, 3, 3), 16 * 3 * 3)
    p["b2"] = unif(ks[5], (16,), 16 * 3 * 3)
    p["g2"] = jax.random.uniform(ks[6], (16,), jnp.float32, 0.5, 1.5)
    p["be2"] = unif(ks[7], (16,), 16)
    p["rm2"] = 0.1 * jax.random.normal(ks[16], (16,), jnp.float32)
    p["rv2"] = jax.random.uniform(ks[17], (16,), jnp.float32, 0.5, 1.5)

    p["wl1"] = unif(ks[8], (144, 128), 144)               # stored (in_features, out)
    p["bl1"] = unif(ks[9], (128,), 144)
    p["g3"] = jax.random.uniform(ks[10], (128,), jnp.float32, 0.5, 1.5)
    p["be3"] = unif(ks[11], (128,), 128)
    p["rm3"] = 0.1 * jax.random.normal(ks[18], (128,), jnp.float32)
    p["rv3"] = jax.random.uniform(ks[19], (128,), jnp.float32, 0.5, 1.5)

    p["wl2"] = unif(ks[12], (128, 136), 128)
    p["bl2"] = unif(ks[13], (136,), 128)
    return p


# ---------------------------------------------------------------------------
if __name__ == "__main__":
    key = jax.random.PRNGKey(0)
    pkey, xkey = jax.random.split(key)
    params = init_params(pkey)

    # Input spatial size 32 is forced by the architecture (16*3*3 flatten).
    x = jax.random.normal(xkey, (2, 3, 32, 32), jnp.float32)   # NCHW, like PyTorch

    ref = jax.block_until_ready(local_cnn_reference(params, x))

    # 1) f32 MXU feeds: tight validation of the fused-kernel structure.
    fwd_f32 = jax.jit(lambda xx: local_cnn_forward_pallas(params, xx, use_bf16=False))
    out_f32 = jax.block_until_ready(fwd_f32(x))
    assert out_f32.shape == (2, 136), out_f32.shape
    assert bool(jnp.all(jnp.isfinite(out_f32)))
    assert bool(jnp.allclose(out_f32, ref, atol=2e-3, rtol=2e-3)), "f32 mismatch"

    # 2) bf16 MXU feeds with f32 accumulation (perf default on v6e/v7x):
    #    looser tolerance accounts for bf16 mantissa on activations/weights.
    fwd_bf16 = jax.jit(lambda xx: local_cnn_forward_pallas(params, xx, use_bf16=True))
    out_bf16 = jax.block_until_ready(fwd_bf16(x))
    assert out_bf16.shape == (2, 136), out_bf16.shape
    assert bool(jnp.all(jnp.isfinite(out_bf16)))
    assert bool(jnp.allclose(out_bf16, ref, atol=2e-2, rtol=2e-2)), "bf16 mismatch"

    print("KERNEL_OK")
</pallas_src>

<mosaic_0001>
module attributes {stable_mosaic.version = 11 : i64} {
  func.func @_local_cnn_kernel(%arg0: i32, %arg1: memref<1x224x108xf32, #tpu.memory_space<vmem>>, %arg2: memref<108x16xf32, #tpu.memory_space<vmem>>, %arg3: memref<1x16xf32, #tpu.memory_space<vmem>>, %arg4: memref<288x56xf32, #tpu.memory_space<vmem>>, %arg5: memref<9x16x16xf32, #tpu.memory_space<vmem>>, %arg6: memref<1x16xf32, #tpu.memory_space<vmem>>, %arg7: memref<16x1152xf32, #tpu.memory_space<vmem>>, %arg8: memref<32x1152xf32, #tpu.memory_space<vmem>>, %arg9: memref<1x128xf32, #tpu.memory_space<vmem>>, %arg10: memref<128x256xf32, #tpu.memory_space<vmem>>, %arg11: memref<1x256xf32, #tpu.memory_space<vmem>>, %arg12: memref<1x1x256xf32, #tpu.memory_space<vmem>>) attributes {dimension_semantics = [#tpu.dimension_semantics<parallel>], iteration_bounds = array<i64: 2>, scalar_prefetch = 0 : i64, scratch_operands = 0 : i64, tpu.core_type = #tpu.core_type<tc>, window_params = [{transform_indices = @transform_0, window_bounds = array<i64: 1, 224, 108>}, {pipeline_mode = #tpu.pipeline_mode<synchronous>, transform_indices = @transform_1, window_bounds = array<i64: 108, 16>}, {pipeline_mode = #tpu.pipeline_mode<synchronous>, transform_indices = @transform_2, window_bounds = array<i64: 1, 16>}, {pipeline_mode = #tpu.pipeline_mode<synchronous>, transform_indices = @transform_3, window_bounds = array<i64: 288, 56>}, {pipeline_mode = #tpu.pipeline_mode<synchronous>, transform_indices = @transform_4, window_bounds = array<i64: 9, 16, 16>}, {pipeline_mode = #tpu.pipeline_mode<synchronous>, transform_indices = @transform_5, window_bounds = array<i64: 1, 16>}, {pipeline_mode = #tpu.pipeline_mode<synchronous>, transform_indices = @transform_6, window_bounds = array<i64: 16, 1152>}, {pipeline_mode = #tpu.pipeline_mode<synchronous>, transform_indices = @transform_7, window_bounds = array<i64: 32, 1152>}, {pipeline_mode = #tpu.pipeline_mode<synchronous>, transform_indices = @transform_8, window_bounds = array<i64: 1, 128>}, {pipeline_mode = #tpu.pipeline_mode<synchronous>, transform_indices = @transform_9, window_bounds = array<i64: 128, 256>}, {pipeline_mode = #tpu.pipeline_mode<synchronous>, transform_indices = @transform_10, window_bounds = array<i64: 1, 256>}, {transform_indices = @transform_11, window_bounds = array<i64: 1, 1, 256>}]} {
    %c0 = arith.constant 0 : index
    %c0_0 = arith.constant 0 : index
    %c0_1 = arith.constant 0 : index
    %0 = vector.load %arg1[%c0, %c0_0, %c0_1] : memref<1x224x108xf32, #tpu.memory_space<vmem>>, vector<1x224x108xf32>
    %1 = vector.shape_cast %0 : vector<1x224x108xf32> to vector<224x108xf32>
    %c0_2 = arith.constant 0 : index
    %c0_3 = arith.constant 0 : index
    %2 = vector.load %arg2[%c0_2, %c0_3] : memref<108x16xf32, #tpu.memory_space<vmem>>, vector<108x16xf32>
    %cst = arith.constant dense<0.000000e+00> : vector<224x16xf32>
    %3 = tpu.matmul %1, %2, %cst {dimension_numbers = #tpu.dot_dimension_numbers<[1], [0], [0], [1], [0, 0, 1, 1], [], []>} : vector<224x108xf32>, vector<108x16xf32>, vector<224x16xf32> -> vector<224x16xf32>
    %c0_4 = arith.constant 0 : index
    %c0_5 = arith.constant 0 : index
    %4 = vector.load %arg3[%c0_4, %c0_5] : memref<1x16xf32, #tpu.memory_space<vmem>>, vector<1x16xf32>
    %5 = vector.broadcast %4 : vector<1x16xf32> to vector<224x16xf32>
    %6 = arith.addf %3, %5 : vector<224x16xf32>
    %cst_6 = arith.constant 0.000000e+00 : f32
    %7 = vector.broadcast %cst_6 : f32 to vector<224x16xf32>
    %8 = arith.maximumf %6, %7 : vector<224x16xf32>
    %9 = vector.extract_strided_slice %8 {offsets = [0, 0], sizes = [56, 16], strides = [1, 1]} : vector<224x16xf32> to vector<56x16xf32>
    %10 = vector.extract_strided_slice %8 {offsets = [56, 0], sizes = [56, 16], strides = [1, 1]} : vector<224x16xf32> to vector<56x16xf32>
    %11 = arith.maximumf %9, %10 : vector<56x16xf32>
    %12 = vector.extract_strided_slice %8 {offsets = [112, 0], sizes = [56, 16], strides = [1, 1]} : vector<224x16xf32> to vector<56x16xf32>
    %13 = vector.extract_strided_slice %8 {offsets = [168, 0], sizes = [56, 16], strides = [1, 1]} : vector<224x16xf32> to vector<56x16xf32>
    %14 = arith.maximumf %12, %13 : vector<56x16xf32>
    %15 = arith.maximumf %11, %14 : vector<56x16xf32>
    %c0_7 = arith.constant 0 : index
    %c0_8 = arith.constant 0 : index
    %16 = vector.load %arg4[%c0_7, %c0_8] : memref<288x56xf32, #tpu.memory_space<vmem>>, vector<288x56xf32>
    %cst_9 = arith.constant dense<0.000000e+00> : vector<288x16xf32>
    %17 = tpu.matmul %16, %15, %cst_9 {dimension_numbers = #tpu.dot_dimension_numbers<[1], [0], [0], [1], [0, 0, 1, 1], [], []>} : vector<288x56xf32>, vector<56x16xf32>, vector<288x16xf32> -> vector<288x16xf32>
    %c0_10 = arith.constant 0 : index
    %c0_11 = arith.constant 0 : index
    %c0_12 = arith.constant 0 : index
    %18 = vector.load %arg5[%c0_10, %c0_11, %c0_12] : memref<9x16x16xf32, #tpu.memory_space<vmem>>, vector<9x16x16xf32>
    %cst_13 = arith.constant 0.000000e+00 : f32
    %19 = vector.broadcast %cst_13 : f32 to vector<32x16xf32>
    %20 = vector.extract_strided_slice %17 {offsets = [0, 0], sizes = [32, 16], strides = [1, 1]} : vector<288x16xf32> to vector<32x16xf32>
    %21 = vector.extract_strided_slice %18 {offsets = [0, 0, 0], sizes = [1, 16, 16], strides = [1, 1, 1]} : vector<9x16x16xf32> to vector<1x16x16xf32>
    %22 = vector.shape_cast %21 : vector<1x16x16xf32> to vector<16x16xf32>
    %cst_14 = arith.constant dense<0.000000e+00> : vector<32x16xf32>
    %23 = tpu.matmul %20, %22, %cst_14 {dimension_numbers = #tpu.dot_dimension_numbers<[1], [0], [0], [1], [0, 0, 1, 1], [], []>} : vector<32x16xf32>, vector<16x16xf32>, vector<32x16xf32> -> vector<32x16xf32>
    %24 = arith.addf %19, %23 : vector<32x16xf32>
    %25 = vector.extract_strided_slice %17 {offsets = [32, 0], sizes = [32, 16], strides = [1, 1]} : vector<288x16xf32> to vector<32x16xf32>
    %26 = vector.extract_strided_slice %18 {offsets = [1, 0, 0], sizes = [1, 16, 16], strides = [1, 1, 1]} : vector<9x16x16xf32> to vector<1x16x16xf32>
    %27 = vector.shape_cast %26 : vector<1x16x16xf32> to vector<16x16xf32>
    %cst_15 = arith.constant dense<0.000000e+00> : vector<32x16xf32>
    %28 = tpu.matmul %25, %27, %cst_15 {dimension_numbers = #tpu.dot_dimension_numbers<[1], [0], [0], [1], [0, 0, 1, 1], [], []>} : vector<32x16xf32>, vector<16x16xf32>, vector<32x16xf32> -> vector<32x16xf32>
    %29 = arith.addf %24, %28 : vector<32x16xf32>
    %30 = vector.extract_strided_slice %17 {offsets = [64, 0], sizes = [32, 16], strides = [1, 1]} : vector<288x16xf32> to vector<32x16xf32>
    %31 = vector.extract_strided_slice %18 {offsets = [2, 0, 0], sizes = [1, 16, 16], strides = [1, 1, 1]} : vector<9x16x16xf32> to vector<1x16x16xf32>
    %32 = vector.shape_cast %31 : vector<1x16x16xf32> to vector<16x16xf32>
    %cst_16 = arith.constant dense<0.000000e+00> : vector<32x16xf32>
    %33 = tpu.matmul %30, %32, %cst_16 {dimension_numbers = #tpu.dot_dimension_numbers<[1], [0], [0], [1], [0, 0, 1, 1], [], []>} : vector<32x16xf32>, vector<16x16xf32>, vector<32x16xf32> -> vector<32x16xf32>
    %34 = arith.addf %29, %33 : vector<32x16xf32>
    %35 = vector.extract_strided_slice %17 {offsets = [96, 0], sizes = [32, 16], strides = [1, 1]} : vector<288x16xf32> to vector<32x16xf32>
    %36 = vector.extract_strided_slice %18 {offsets = [3, 0, 0], sizes = [1, 16, 16], strides = [1, 1, 1]} : vector<9x16x16xf32> to vector<1x16x16xf32>
    %37 = vector.shape_cast %36 : vector<1x16x16xf32> to vector<16x16xf32>
    %cst_17 = arith.constant dense<0.000000e+00> : vector<32x16xf32>
    %38 = tpu.matmul %35, %37, %cst_17 {dimension_numbers = #tpu.dot_dimension_numbers<[1], [0], [0], [1], [0, 0, 1, 1], [], []>} : vector<32x16xf32>, vector<16x16xf32>, vector<32x16xf32> -> vector<32x16xf32>
    %39 = arith.addf %34, %38 : vector<32x16xf32>
    %40 = vector.extract_strided_slice %17 {offsets = [128, 0], sizes = [32, 16], strides = [1, 1]} : vector<288x16xf32> to vector<32x16xf32>
    %41 = vector.extract_strided_slice %18 {offsets = [4, 0, 0], sizes = [1, 16, 16], strides = [1, 1, 1]} : vector<9x16x16xf32> to vector<1x16x16xf32>
    %42 = vector.shape_cast %41 : vector<1x16x16xf32> to vector<16x16xf32>
    %cst_18 = arith.constant dense<0.000000e+00> : vector<32x16xf32>
    %43 = tpu.matmul %40, %42, %cst_18 {dimension_numbers = #tpu.dot_dimension_numbers<[1], [0], [0], [1], [0, 0, 1, 1], [], []>} : vector<32x16xf32>, vector<16x16xf32>, vector<32x16xf32> -> vector<32x16xf32>
    %44 = arith.addf %39, %43 : vector<32x16xf32>
    %45 = vector.extract_strided_slice %17 {offsets = [160, 0], sizes = [32, 16], strides = [1, 1]} : vector<288x16xf32> to vector<32x16xf32>
    %46 = vector.extract_strided_slice %18 {offsets = [5, 0, 0], sizes = [1, 16, 16], strides = [1, 1, 1]} : vector<9x16x16xf32> to vector<1x16x16xf32>
    %47 = vector.shape_cast %46 : vector<1x16x16xf32> to vector<16x16xf32>
    %cst_19 = arith.constant dense<0.000000e+00> : vector<32x16xf32>
    %48 = tpu.matmul %45, %47, %cst_19 {dimension_numbers = #tpu.dot_dimension_numbers<[1], [0], [0], [1], [0, 0, 1, 1], [], []>} : vector<32x16xf32>, vector<16x16xf32>, vector<32x16xf32> -> vector<32x16xf32>
    %49 = arith.addf %44, %48 : vector<32x16xf32>
    %50 = vector.extract_strided_slice %17 {offsets = [192, 0], sizes = [32, 16], strides = [1, 1]} : vector<288x16xf32> to vector<32x16xf32>
    %51 = vector.extract_strided_slice %18 {offsets = [6, 0, 0], sizes = [1, 16, 16], strides = [1, 1, 1]} : vector<9x16x16xf32> to vector<1x16x16xf32>
    %52 = vector.shape_cast %51 : vector<1x16x16xf32> to vector<16x16xf32>
    %cst_20 = arith.constant dense<0.000000e+00> : vector<32x16xf32>
    %53 = tpu.matmul %50, %52, %cst_20 {dimension_numbers = #tpu.dot_dimension_numbers<[1], [0], [0], [1], [0, 0, 1, 1], [], []>} : vector<32x16xf32>, vector<16x16xf32>, vector<32x16xf32> -> vector<32x16xf32>
    %54 = arith.addf %49, %53 : vector<32x16xf32>
    %55 = vector.extract_strided_slice %17 {offsets = [224, 0], sizes = [32, 16], strides = [1, 1]} : vector<288x16xf32> to vector<32x16xf32>
    %56 = vector.extract_strided_slice %18 {offsets = [7, 0, 0], sizes = [1, 16, 16], strides = [1, 1, 1]} : vector<9x16x16xf32> to vector<1x16x16xf32>
    %57 = vector.shape_cast %56 : vector<1x16x16xf32> to vector<16x16xf32>
    %cst_21 = arith.constant dense<0.000000e+00> : vector<32x16xf32>
    %58 = tpu.matmul %55, %57, %cst_21 {dimension_numbers = #tpu.dot_dimension_numbers<[1], [0], [0], [1], [0, 0, 1, 1], [], []>} : vector<32x16xf32>, vector<16x16xf32>, vector<32x16xf32> -> vector<32x16xf32>
    %59 = arith.addf %54, %58 : vector<32x16xf32>
    %60 = vector.extract_strided_slice %17 {offsets = [256, 0], sizes = [32, 16], strides = [1, 1]} : vector<288x16xf32> to vector<32x16xf32>
    %61 = vector.extract_strided_slice %18 {offsets = [8, 0, 0], sizes = [1, 16, 16], strides = [1, 1, 1]} : vector<9x16x16xf32> to vector<1x16x16xf32>
    %62 = vector.shape_cast %61 : vector<1x16x16xf32> to vector<16x16xf32>
    %cst_22 = arith.constant dense<0.000000e+00> : vector<32x16xf32>
    %63 = tpu.matmul %60, %62, %cst_22 {dimension_numbers = #tpu.dot_dimension_numbers<[1], [0], [0], [1], [0, 0, 1, 1], [], []>} : vector<32x16xf32>, vector<16x16xf32>, vector<32x16xf32> -> vector<32x16xf32>
    %64 = arith.addf %59, %63 : vector<32x16xf32>
    %c0_23 = arith.constant 0 : index
    %c0_24 = arith.constant 0 : index
    %65 = vector.load %arg6[%c0_23, %c0_24] : memref<1x16xf32, #tpu.memory_space<vmem>>, vector<1x16xf32>
    %66 = vector.broadcast %65 : vector<1x16xf32> to vector<32x16xf32>
    %67 = arith.addf %64, %66 : vector<32x16xf32>
    %cst_25 = arith.constant 0.000000e+00 : f32
    %68 = vector.broadcast %cst_25 : f32 to vector<32x16xf32>
    %69 = arith.maximumf %67, %68 : vector<32x16xf32>
    %c0_26 = arith.constant 0 : index
    %c0_27 = arith.constant 0 : index
    %70 = vector.load %arg7[%c0_26, %c0_27] : memref<16x1152xf32, #tpu.memory_space<vmem>>, vector<16x1152xf32>
    %cst_28 = arith.constant dense<0.000000e+00> : vector<32x1152xf32>
    %71 = tpu.matmul %69, %70, %cst_28 {dimension_numbers = #tpu.dot_dimension_numbers<[1], [0], [0], [1], [0, 0, 1, 1], [], []>} : vector<32x16xf32>, vector<16x1152xf32>, vector<32x1152xf32> -> vector<32x1152xf32>
    %c0_29 = arith.constant 0 : index
    %c0_30 = arith.constant 0 : index
    %72 = vector.load %arg8[%c0_29, %c0_30] : memref<32x1152xf32, #tpu.memory_space<vmem>>, vector<32x1152xf32>
    %cst_31 = arith.constant 0.000000e+00 : f32
    %73 = vector.broadcast %cst_31 : f32 to vector<1x128xf32>
    %74 = vector.extract_strided_slice %71 {offsets = [0, 0], sizes = [32, 128], strides = [1, 1]} : vector<32x1152xf32> to vector<32x128xf32>
    %75 = vector.extract_strided_slice %72 {offsets = [0, 0], sizes = [32, 128], strides = [1, 1]} : vector<32x1152xf32> to vector<32x128xf32>
    %76 = arith.mulf %74, %75 : vector<32x128xf32>
    %cst_32 = arith.constant dense<0.000000e+00> : vector<128xf32>
    %77 = vector.multi_reduction <add>, %76, %cst_32 [0] : vector<32x128xf32> to vector<128xf32>
    %78 = vector.shape_cast %77 : vector<128xf32> to vector<1x128xf32>
    %79 = arith.addf %73, %78 : vector<1x128xf32>
    %80 = vector.extract_strided_slice %71 {offsets = [0, 128], sizes = [32, 128], strides = [1, 1]} : vector<32x1152xf32> to vector<32x128xf32>
    %81 = vector.extract_strided_slice %72 {offsets = [0, 128], sizes = [32, 128], strides = [1, 1]} : vector<32x1152xf32> to vector<32x128xf32>
    %82 = arith.mulf %80, %81 : vector<32x128xf32>
    %cst_33 = arith.constant dense<0.000000e+00> : vector<128xf32>
    %83 = vector.multi_reduction <add>, %82, %cst_33 [0] : vector<32x128xf32> to vector<128xf32>
    %84 = vector.shape_cast %83 : vector<128xf32> to vector<1x128xf32>
    %85 = arith.addf %79, %84 : vector<1x128xf32>
    %86 = vector.extract_strided_slice %71 {offsets = [0, 256], sizes = [32, 128], strides = [1, 1]} : vector<32x1152xf32> to vector<32x128xf32>
    %87 = vector.extract_strided_slice %72 {offsets = [0, 256], sizes = [32, 128], strides = [1, 1]} : vector<32x1152xf32> to vector<32x128xf32>
    %88 = arith.mulf %86, %87 : vector<32x128xf32>
    %cst_34 = arith.constant dense<0.000000e+00> : vector<128xf32>
    %89 = vector.multi_reduction <add>, %88, %cst_34 [0] : vector<32x128xf32> to vector<128xf32>
    %90 = vector.shape_cast %89 : vector<128xf32> to vector<1x128xf32>
    %91 = arith.addf %85, %90 : vector<1x128xf32>
    %92 = vector.extract_strided_slice %71 {offsets = [0, 384], sizes = [32, 128], strides = [1, 1]} : vector<32x1152xf32> to vector<32x128xf32>
    %93 = vector.extract_strided_slice %72 {offsets = [0, 384], sizes = [32, 128], strides = [1, 1]} : vector<32x1152xf32> to vector<32x128xf32>
    %94 = arith.mulf %92, %93 : vector<32x128xf32>
    %cst_35 = arith.constant dense<0.000000e+00> : vector<128xf32>
    %95 = vector.multi_reduction <add>, %94, %cst_35 [0] : vector<32x128xf32> to vector<128xf32>
    %96 = vector.shape_cast %95 : vector<128xf32> to vector<1x128xf32>
    %97 = arith.addf %91, %96 : vector<1x128xf32>
    %98 = vector.extract_strided_slice %71 {offsets = [0, 512], sizes = [32, 128], strides = [1, 1]} : vector<32x1152xf32> to vector<32x128xf32>
    %99 = vector.extract_strided_slice %72 {offsets = [0, 512], sizes = [32, 128], strides = [1, 1]} : vector<32x1152xf32> to vector<32x128xf32>
    %100 = arith.mulf %98, %99 : vector<32x128xf32>
    %cst_36 = arith.constant dense<0.000000e+00> : vector<128xf32>
    %101 = vector.multi_reduction <add>, %100, %cst_36 [0] : vector<32x128xf32> to vector<128xf32>
    %102 = vector.shape_cast %101 : vector<128xf32> to vector<1x128xf32>
    %103 = arith.addf %97, %102 : vector<1x128xf32>
    %104 = vector.extract_strided_slice %71 {offsets = [0, 640], sizes = [32, 128], strides = [1, 1]} : vector<32x1152xf32> to vector<32x128xf32>
    %105 = vector.extract_strided_slice %72 {offsets = [0, 640], sizes = [32, 128], strides = [1, 1]} : vector<32x1152xf32> to vector<32x128xf32>
    %106 = arith.mulf %104, %105 : vector<32x128xf32>
    %cst_37 = arith.constant dense<0.000000e+00> : vector<128xf32>
    %107 = vector.multi_reduction <add>, %106, %cst_37 [0] : vector<32x128xf32> to vector<128xf32>
    %108 = vector.shape_cast %107 : vector<128xf32> to vector<1x128xf32>
    %109 = arith.addf %103, %108 : vector<1x128xf32>
    %110 = vector.extract_strided_slice %71 {offsets = [0, 768], sizes = [32, 128], strides = [1, 1]} : vector<32x1152xf32> to vector<32x128xf32>
    %111 = vector.extract_strided_slice %72 {offsets = [0, 768], sizes = [32, 128], strides = [1, 1]} : vector<32x1152xf32> to vector<32x128xf32>
    %112 = arith.mulf %110, %111 : vector<32x128xf32>
    %cst_38 = arith.constant dense<0.000000e+00> : vector<128xf32>
    %113 = vector.multi_reduction <add>, %112, %cst_38 [0] : vector<32x128xf32> to vector<128xf32>
    %114 = vector.shape_cast %113 : vector<128xf32> to vector<1x128xf32>
    %115 = arith.addf %109, %114 : vector<1x128xf32>
    %116 = vector.extract_strided_slice %71 {offsets = [0, 896], sizes = [32, 128], strides = [1, 1]} : vector<32x1152xf32> to vector<32x128xf32>
    %117 = vector.extract_strided_slice %72 {offsets = [0, 896], sizes = [32, 128], strides = [1, 1]} : vector<32x1152xf32> to vector<32x128xf32>
    %118 = arith.mulf %116, %117 : vector<32x128xf32>
    %cst_39 = arith.constant dense<0.000000e+00> : vector<128xf32>
    %119 = vector.multi_reduction <add>, %118, %cst_39 [0] : vector<32x128xf32> to vector<128xf32>
    %120 = vector.shape_cast %119 : vector<128xf32> to vector<1x128xf32>
    %121 = arith.addf %115, %120 : vector<1x128xf32>
    %122 = vector.extract_strided_slice %71 {offsets = [0, 1024], sizes = [32, 128], strides = [1, 1]} : vector<32x1152xf32> to vector<32x128xf32>
    %123 = vector.extract_strided_slice %72 {offsets = [0, 1024], sizes = [32, 128], strides = [1, 1]} : vector<32x1152xf32> to vector<32x128xf32>
    %124 = arith.mulf %122, %123 : vector<32x128xf32>
    %cst_40 = arith.constant dense<0.000000e+00> : vector<128xf32>
    %125 = vector.multi_reduction <add>, %124, %cst_40 [0] : vector<32x128xf32> to vector<128xf32>
    %126 = vector.shape_cast %125 : vector<128xf32> to vector<1x128xf32>
    %127 = arith.addf %121, %126 : vector<1x128xf32>
    %c0_41 = arith.constant 0 : index
    %c0_42 = arith.constant 0 : index
    %128 = vector.load %arg9[%c0_41, %c0_42] : memref<1x128xf32, #tpu.memory_space<vmem>>, vector<1x128xf32>
    %129 = arith.addf %127, %128 : vector<1x128xf32>
    %cst_43 = arith.constant 0.000000e+00 : f32
    %130 = vector.broadcast %cst_43 : f32 to vector<1x128xf32>
    %131 = arith.maximumf %129, %130 : vector<1x128xf32>
    %c0_44 = arith.constant 0 : index
    %c0_45 = arith.constant 0 : index
    %132 = vector.load %arg10[%c0_44, %c0_45] : memref<128x256xf32, #tpu.memory_space<vmem>>, vector<128x256xf32>
    %cst_46 = arith.constant dense<0.000000e+00> : vector<1x256xf32>
    %133 = tpu.matmul %131, %132, %cst_46 {dimension_numbers = #tpu.dot_dimension_numbers<[1], [0], [0], [1], [0, 0, 1, 1], [], []>} : vector<1x128xf32>, vector<128x256xf32>, vector<1x256xf32> -> vector<1x256xf32>
    %c0_47 = arith.constant 0 : index
    %c0_48 = arith.constant 0 : index
    %134 = vector.load %arg11[%c0_47, %c0_48] : memref<1x256xf32, #tpu.memory_space<vmem>>, vector<1x256xf32>
    %135 = arith.addf %133, %134 : vector<1x256xf32>
    %c0_49 = arith.constant 0 : index
    %c0_50 = arith.constant 0 : index
    %c0_51 = arith.constant 0 : index
    %136 = vector.load %arg12[%c0_49, %c0_50, %c0_51] : memref<1x1x256xf32, #tpu.memory_space<vmem>>, vector<1x1x256xf32>
    %137 = vector.shape_cast %136 : vector<1x1x256xf32> to vector<1x256xf32>
    %138 = vector.shape_cast %135 : vector<1x256xf32> to vector<1x1x256xf32>
    tpu.vector_store %arg12[%c0_49, %c0_50, %c0_51], %138 {strides = array<i32>} : memref<1x1x256xf32, #tpu.memory_space<vmem>>, vector<1x1x256xf32>,
    return
  }
  func.func @transform_0(%arg0: i32) -> (i32, i32, i32) {
    %c0_i32 = arith.constant 0 : i32
    %c0_i32_0 = arith.constant 0 : i32
    %c0_i32_1 = arith.constant 0 : i32
    return %arg0, %c0_i32, %c0_i32_0 : i32, i32, i32
  }
  func.func @transform_1(%arg0: i32) -> (i32, i32) {
    %c0_i32 = arith.constant 0 : i32
    %c0_i32_0 = arith.constant 0 : i32
    %c0_i32_1 = arith.constant 0 : i32
    return %c0_i32, %c0_i32_0 : i32, i32
  }
  func.func @transform_2(%arg0: i32) -> (i32, i32) {
    %c0_i32 = arith.constant 0 : i32
    %c0_i32_0 = arith.constant 0 : i32
    %c0_i32_1 = arith.constant 0 : i32
    return %c0_i32, %c0_i32_0 : i32, i32
  }
  func.func @transform_3(%arg0: i32) -> (i32, i32) {
    %c0_i32 = arith.constant 0 : i32
    %c0_i32_0 = arith.constant 0 : i32
    %c0_i32_1 = arith.constant 0 : i32
    return %c0_i32, %c0_i32_0 : i32, i32
  }
  func.func @transform_4(%arg0: i32) -> (i32, i32, i32) {
    %c0_i32 = arith.constant 0 : i32
    %c0_i32_0 = arith.constant 0 : i32
    %c0_i32_1 = arith.constant 0 : i32
    %c0_i32_2 = arith.constant 0 : i32
    return %c0_i32, %c0_i32_0, %c0_i32_1 : i32, i32, i32
  }
  func.func @transform_5(%arg0: i32) -> (i32, i32) {
    %c0_i32 = arith.constant 0 : i32
    %c0_i32_0 = arith.constant 0 : i32
    %c0_i32_1 = arith.constant 0 : i32
    return %c0_i32, %c0_i32_0 : i32, i32
  }
  func.func @transform_6(%arg0: i32) -> (i32, i32) {
    %c0_i32 = arith.constant 0 : i32
    %c0_i32_0 = arith.constant 0 : i32
    %c0_i32_1 = arith.constant 0 : i32
    return %c0_i32, %c0_i32_0 : i32, i32
  }
  func.func @transform_7(%arg0: i32) -> (i32, i32) {
    %c0_i32 = arith.constant 0 : i32
    %c0_i32_0 = arith.constant 0 : i32
    %c0_i32_1 = arith.constant 0 : i32
    return %c0_i32, %c0_i32_0 : i32, i32
  }
  func.func @transform_8(%arg0: i32) -> (i32, i32) {
    %c0_i32 = arith.constant 0 : i32
    %c0_i32_0 = arith.constant 0 : i32
    %c0_i32_1 = arith.constant 0 : i32
    return %c0_i32, %c0_i32_0 : i32, i32
  }
  func.func @transform_9(%arg0: i32) -> (i32, i32) {
    %c0_i32 = arith.constant 0 : i32
    %c0_i32_0 = arith.constant 0 : i32
    %c0_i32_1 = arith.constant 0 : i32
    return %c0_i32, %c0_i32_0 : i32, i32
  }
  func.func @transform_10(%arg0: i32) -> (i32, i32) {
    %c0_i32 = arith.constant 0 : i32
    %c0_i32_0 = arith.constant 0 : i32
    %c0_i32_1 = arith.constant 0 : i32
    return %c0_i32, %c0_i32_0 : i32, i32
  }
  func.func @transform_11(%arg0: i32) -> (i32, i32, i32) {
    %c0_i32 = arith.constant 0 : i32
    %c0_i32_0 = arith.constant 0 : i32
    %c0_i32_1 = arith.constant 0 : i32
    return %arg0, %c0_i32, %c0_i32_0 : i32, i32, i32
  }
}

</mosaic_0001>

<bundles_post_ra>
// kernel: _lambda_.1
= control target key start
LH: loop header
LB: loop body
LE: loop exit
PB: predicated region body
PF: predicated region fallthrough
CT: control target
= control target key end

     0   :  { %s3691_s17 = smov 0   ;;  %s4404_s0 = inlined_call_operand.vmem [shape: f32[2,224,108], index: 0, kind: input, shape index: {}]   ;;  %s4405_s1 = inlined_call_operand.vmem [shape: f32[108,16], index: 1, kind: input, shape index: {}]   ;;  %s4406_s2 = inlined_call_operand.vmem [shape: f32[1,16], index: 2, kind: input, shape index: {}]   ;;  %s4407_s3 = inlined_call_operand.vmem [shape: f32[288,56], index: 3, kind: input, shape index: {}]   ;;  %s4408_s4 = inlined_call_operand.vmem [shape: f32[9,16,16], index: 4, kind: input, shape index: {}]   ;;  %s4409_s5 = inlined_call_operand.vmem [shape: f32[1,16], index: 5, kind: input, shape index: {}]   ;;  %s4410_s6 = inlined_call_operand.vmem [shape: f32[16,1152], index: 6, kind: input, shape index: {}]   ;;  %s4411_s7 = inlined_call_operand.vmem [shape: f32[32,1152], index: 7, kind: input, shape index: {}]   ;;  %s4412_s8 = inlined_call_operand.vmem [shape: f32[1,128], index: 8, kind: input, shape index: {}]   ;;  %s4413_s9 = inlined_call_operand.vmem [shape: f32[128,256], index: 9, kind: input, shape index: {}]   ;;  %s4414_s10 = inlined_call_operand.vmem [shape: f32[1,256], index: 10, kind: input, shape index: {}]   ;;  %s4415_s11 = inlined_call_operand.vmem [shape: f32[2,1,256], index: 11, kind: output, shape index: {}]  }
   0x1 LB: > { %s2929_s18 = sadd.s32 4294967295, %s3626_s17   ;;  %p2933_p0 = scmp.ge.s32.totalorder %s3626_s17, 1  ;;  %s3626_s17 = sphi %s3691_s17, %s21_s17  }
   0x2   : > { %p337_p1 = scmp.lt.s32.totalorder %s3626_s17, 3 }
   0x4   : > { %p338_p2 = pnand %p2933_p0, %p337_p1 }
   0x5   : > { %v413_v0 = vld [vmem:[%s4405_s1] sm:$0xff] (!%p338_p2)  ;;  %v414_v1 = vld [vmem:[%s4405_s1 + $0x8] sm:$0xff] (!%p338_p2)  ;;  %v415_v2 = vld [vmem:[%s4405_s1 + $0x10] sm:$0xff] (!%p338_p2)  ;;  %p376_p3 = scmp.lt.s32.totalorder (!%p338_p2), %s2929_s18, 1  ;;  %vm434_vm0 = vcmask (!%p338_p2), 883712   ;;  %vm519_vm1 = vcmask (!%p338_p2), 1043456  }
   0x6   : > { %341 = sbr.rel (%p338_p2) target bundleno = 1341 (0x53d), region = 64  ;;  %v3444_v3 = vpack.c.bf16 (!%p338_p2), %v414_v1, %v413_v0  ;;  %v416_v4 = vld [vmem:[%s4405_s1 + $0x18] sm:$0xff] (!%p338_p2)  ;;  %v417_v6 = vld [vmem:[%s4405_s1 + $0x20] sm:$0xff] (!%p338_p2)  ;;  %v418_v7 = vld [vmem:[%s4405_s1 + $0x28] sm:$0xff] (!%p338_p2)  ;;  %vm3628_vm2 = vmmov (!%p338_p2), 1   ;;  %vm813_vm4 = vcmask (!%p338_p2), 457728  }
   0x7   : > { %v3448_v5 = vpack.c.bf16 (!%p338_p2), %v416_v4, %v415_v2  ;;  %v3452_v8 = vpack.c.bf16 (!%p338_p2), %v418_v7, %v417_v6  ;;  %v419_v9 = vld [vmem:[%s4405_s1 + $0x30] sm:$0xff] (!%p338_p2)  ;;  %v420_v10 = vld [vmem:[%s4405_s1 + $0x38] sm:$0xff] (!%p338_p2)  ;;  %v421_v13 = vld [vmem:[%s4405_s1 + $0x40] sm:$0xff] (!%p338_p2)  ;;  %vm1185_vm5 = vcmask (!%p338_p2), 130048  }
   0x8   : > { %3445 = vmatprep.subr.bf16.mxu0 (!%p338_p2), %v3444_v3  ;;  %v3456_v12 = vpack.c.bf16 (!%p338_p2), %v420_v10, %v419_v9  ;;  %v422_v14 = vld [vmem:[%s4405_s1 + $0x48] sm:$0xff] (!%p338_p2)  ;;  %v423_v16 = vld [vmem:[%s4405_s1 + $0x50] sm:$0xff] (!%p338_p2)  ;;  %v424_v17 = vld [vmem:[%s4405_s1 + $0x58] sm:$0xff] (!%p338_p2) }
   0x9   : > { %3447 = vmatpush3.bf16.msra.mxu0 (!%p338_p2), %v3444_v3  ;;  %v3460_v15 = vpack.c.bf16 (!%p338_p2), %v422_v14, %v421_v13  ;;  %v3464_v18 = vpack.c.bf16 (!%p338_p2), %v424_v17, %v423_v16  ;;  %v425_v19 = vld [vmem:[%s4405_s1 + $0x60] sm:$0xff] (!%p338_p2)  ;;  %v426_v20 = vld [vmem:[%s4405_s1 + $0x68] sm:$0xf] (!%p338_p2)  ;;  %vm3469_vm3 = vmpackc.low (!%p338_p2), %vm519_vm1, %vm3628_vm2 }
   0xa   : > { %3449 = vmatprep.subr.bf16.mxu0 (!%p338_p2), %v3448_v5  ;;  %v3468_v21 = vpack.c.bf16 (!%p338_p2), %v426_v20, %v425_v19  ;;  %v777_v49 = vld [vmem:[%s4407_s3] sm:$0xff] (!%p338_p2)  ;;  %v1168_v58 = vld [vmem:[%s4408_s4 + $0x8] sm:$0xff] (!%p338_p2) }
   0xb   : > { %3290 = vmatprep.mubr.msk.f32.mxu1 (!%p338_p2), %vm813_vm4, %v777_v49  ;;  %v3812_v54 = vld [vmem:[%s4406_s2] ss:$0 sm:$0xff] (!%p338_p2) }
   0xc   : > { %v1167_v57 = vld [vmem:[%s4408_s4] sm:$0xff] (!%p338_p2) }
   0xd   : > { %s4417_s18 = smov (!%p376_p3, %s2929_s18), 1  ;;  %3451 = vmatpush3.bf16.msra.mxu0 %v3448_v5  ;;  %v3821_v60 = vpack.c.bf16 %v1168_v58, %v1167_v57 }
   0xe   : > { %s3608_s12 = smul.u32 224, %s4417_s18  ;;  %3453 = vmatprep.subr.bf16.mxu0 %v3452_v8  ;;  %s2935_s14 = sshll.u32 %s4417_s18, 1 }
   0xf   : > { %s384_s19 = scalar_lea.vmem %s4415_s11, %s2935_s14 }
  0x10   : > { %s3729_s21 = scalar_lea.vmem %s4404_s0, %s3608_s12 }
  0x11   : > { %v385_v11 = vld [vmem:[%s3729_s21] sm:$0xff]  ;;  %3455 = vmatpush3.bf16.msra.mxu0 %v3452_v8  ;;  %v386_v22 = vld [vmem:[%s3729_s21 + $0x8] sm:$0xff]  ;;  %v387_v23 = vld [vmem:[%s3729_s21 + $0x10] sm:$0xff] }
  0x12   : > { %3234 = vmatprep.mubr.msk.f32.mxu0 %vm434_vm0, %v385_v11  ;;  %3457 = vmatprep.subr.bf16.mxu0 %v3456_v12  ;;  %v388_v24 = vld [vmem:[%s3729_s21 + $0x18] sm:$0xff]  ;;  %v389_v25 = vld [vmem:[%s3729_s21 + $0x20] sm:$0xff]  ;;  %v390_v26 = vld [vmem:[%s3729_s21 + $0x28] sm:$0xff] }
  0x13   : > { %v391_v27 = vld [vmem:[%s3729_s21 + $0x30] sm:$0xff]  ;;  %v392_v28 = vld [vmem:[%s3729_s21 + $0x38] sm:$0xff]  ;;  %v393_v29 = vld [vmem:[%s3729_s21 + $0x40] sm:$0xff] }
  0x14   : > { %v394_v30 = vld [vmem:[%s3729_s21 + $0x48] sm:$0xff]  ;;  %v395_v31 = vld [vmem:[%s3729_s21 + $0x50] sm:$0xff]  ;;  %v396_v32 = vld [vmem:[%s3729_s21 + $0x58] sm:$0xff] }
  0x15   : > { %3459 = vmatpush3.bf16.msra.mxu0 %v3456_v12  ;;  %v397_v33 = vld [vmem:[%s3729_s21 + $0x60] sm:$0xff]  ;;  %v398_v34 = vld [vmem:[%s3729_s21 + $0x68] sm:$0xff]  ;;  %v399_v35 = vld [vmem:[%s3729_s21 + $0x70] sm:$0xff] }
  0x16   : > { %3461 = vmatprep.subr.bf16.mxu0 %v3460_v15  ;;  %v400_v36 = vld [vmem:[%s3729_s21 + $0x78] sm:$0xff]  ;;  %v401_v37 = vld [vmem:[%s3729_s21 + $0x80] sm:$0xff]  ;;  %v402_v38 = vld [vmem:[%s3729_s21 + $0x88] sm:$0xff] }
  0x17   : > { %v403_v39 = vld [vmem:[%s3729_s21 + $0x90] sm:$0xff]  ;;  %v404_v40 = vld [vmem:[%s3729_s21 + $0x98] sm:$0xff]  ;;  %v405_v41 = vld [vmem:[%s3729_s21 + $0xa0] sm:$0xff] }
  0x18   : > { %v406_v42 = vld [vmem:[%s3729_s21 + $0xa8] sm:$0xff]  ;;  %v407_v43 = vld [vmem:[%s3729_s21 + $0xb0] sm:$0xff]  ;;  %v408_v44 = vld [vmem:[%s3729_s21 + $0xb8] sm:$0xff] }
  0x19   : > { %3463 = vmatpush3.bf16.msra.mxu0 %v3460_v15  ;;  %v409_v45 = vld [vmem:[%s3729_s21 + $0xc0] sm:$0xff]  ;;  %v410_v46 = vld [vmem:[%s3729_s21 + $0xc8] sm:$0xff]  ;;  %v411_v47 = vld [vmem:[%s3729_s21 + $0xd0] sm:$0xff] }
  0x1a   : > { %3465 = vmatprep.subr.bf16.mxu0 %v3464_v18  ;;  %v412_v48 = vld [vmem:[%s3729_s21 + $0xd8] sm:$0xff] }
  0x1d   : > { %3467 = vmatpush3.bf16.msra.mxu0 %v3464_v18 }
  0x1e   : > { %3470 = vmatprep.subr.msk.bf16.mxu0 %vm3469_vm3, %v3468_v21 }
  0x21   : > { %3473 = vmatpush3.bf16.msk.msra.mxu0 %vm3469_vm3, %v3468_v21 }
  0x22   : > { %3491 = vmatprep.subr.bf16.mxu0 %v3821_v60 }
  0x24   : > { %3235 = vmatmul.mubr.msk.f32.vlgmr.msra.gmra.mrb[0].mxu0 %vm434_vm0, %v386_v22 }
  0x25   : > { %3237 = vmatprep.mubr.msk.f32.mxu0 %vm434_vm0, %v387_v23  ;;  %3493 = vmatpush3.bf16.msra.mxu0 %v3821_v60 }
  0x28   : > { %3238 = vmatmul.mubr.msk.f32.gmra.mrb[2].mxu0 %vm434_vm0, %v388_v24 }
  0x29   : > { %3240 = vmatprep.mubr.msk.f32.mxu0 %vm434_vm0, %v389_v25 }
  0x2c   : > { %3241 = vmatmul.mubr.msk.f32.gmra.mrb[4].mxu0 %vm434_vm0, %v390_v26 }
  0x2d   : > { %3243 = vmatprep.mubr.msk.f32.mxu0 %vm434_vm0, %v391_v27 }
  0x30   : > { %3244 = vmatmul.mubr.msk.f32.gmra.mrb[6].mxu0 %vm434_vm0, %v392_v28 }
  0x31   : > { %3246 = vmatprep.mubr.msk.f32.mxu0 %vm434_vm0, %v393_v29 }
  0x34   : > { %3247 = vmatmul.mubr.msk.f32.gmra.mrb[8].mxu0 %vm434_vm0, %v394_v30 }
  0x35   : > { %3249 = vmatprep.mubr.msk.f32.mxu0 %vm434_vm0, %v395_v31 }
  0x38   : > { %3250 = vmatmul.mubr.msk.f32.gmra.mrb[10].mxu0 %vm434_vm0, %v396_v32 }
  0x39   : > { %3252 = vmatprep.mubr.msk.f32.mxu0 %vm434_vm0, %v397_v33 }
  0x3c   : > { %3253 = vmatmul.mubr.msk.f32.gmra.mrb[12].mxu0 %vm434_vm0, %v398_v34 }
  0x3d   : > { %3255 = vmatprep.mubr.msk.f32.mxu0 %vm434_vm0, %v399_v35 }
  0x40   : > { %3256 = vmatmul.mubr.msk.f32.gmra.mrb[14].mxu0 %vm434_vm0, %v400_v36 }
  0x41   : > { %3258 = vmatprep.mubr.msk.f32.mxu0 %vm434_vm0, %v401_v37 }
  0x44   : > { %3259 = vmatmul.mubr.msk.f32.gmra.mrb[16].mxu0 %vm434_vm0, %v402_v38 }
  0x45   : > { %3261 = vmatprep.mubr.msk.f32.mxu0 %vm434_vm0, %v403_v39 }
  0x48   : > { %3262 = vmatmul.mubr.msk.f32.gmra.mrb[18].mxu0 %vm434_vm0, %v404_v40 }
  0x49   : > { %3264 = vmatprep.mubr.msk.f32.mxu0 %vm434_vm0, %v405_v41 }
  0x4c   : > { %3265 = vmatmul.mubr.msk.f32.gmra.mrb[20].mxu0 %vm434_vm0, %v406_v42 }
  0x4d   : > { %3267 = vmatprep.mubr.msk.f32.mxu0 %vm434_vm0, %v407_v43 }
  0x50   : > { %3268 = vmatmul.mubr.msk.f32.gmra.mrb[22].mxu0 %vm434_vm0, %v408_v44 }
  0x51   : > { %3270 = vmatprep.mubr.msk.f32.mxu0 %vm434_vm0, %v409_v45 }
  0x54   : > { %3271 = vmatmul.mubr.msk.f32.gmra.mrb[24].mxu0 %vm434_vm0, %v410_v46 }
  0x55   : > { %3273 = vmatprep.mubr.msk.f32.mxu0 %vm434_vm0, %v411_v47 }
  0x58   : > { %3274 = vmatmul.mubr.msk.f32.gmra.mrb[26].mxu0 %vm434_vm0, %v412_v48 }
  0xf7   : > { %v3236_v50 = vpop.f32.mrb[0].mxu0 }
  0xf8   : > { %v589_v51 = vpop.f32.mrb[1].mxu0  ;;  %v595_v3 = vadd.f32 %v3236_v50, %v3812_v54 }
  0xf9   : > { %v590_v59 = vadd.f32 %v3812_v54, %v589_v51 }
  0xfa   : > { %v729_v12 = vmax.f32 %v595_v3, 0.0 }
  0xfb   : > { %v3239_v52 = vpop.f32.mrb[2].mxu0  ;;  %v728_v0 = vmax.f32 %v590_v59, 0.0 }
  0xfc   : > { %v599_v53 = vpop.f32.mrb[3].mxu0  ;;  %v605_v13 = vadd.f32 %v3239_v52, %v3812_v54 }
  0xfd   : > { %v600_v1 = vadd.f32 %v3812_v54, %v599_v53 }
  0xfe   : > { %v731_v24 = vmax.f32 %v605_v13, 0.0 }
  0xff   : > { %v3242_v55 = vpop.f32.mrb[4].mxu0  ;;  %v730_v9 = vmax.f32 %v600_v1, 0.0 }
 0x100   : > { %v609_v56 = vpop.f32.mrb[5].mxu0  ;;  %v615_v25 = vadd.f32 %v3242_v55, %v3812_v54 }
 0x101   : > { %v610_v10 = vadd.f32 %v3812_v54, %v609_v56 }
 0x102   : > { %v733_v35 = vmax.f32 %v615_v25, 0.0 }
 0x103   : > { %v3245_v61 = vpop.f32.mrb[6].mxu0  ;;  %v732_v21 = vmax.f32 %v610_v10, 0.0 }
 0x104   : > { %v625_v62 = vadd.f32 %v3245_v61, %v3812_v54  ;;  %v619_v63 = vpop.f32.mrb[7].mxu0 }
 0x105   : > { %v620_v22 = vadd.f32 %v3812_v54, %v619_v63 }
 0x106   : > { %v735_v2 = vmax.f32 %v625_v62, 0.0 }
 0x107   : > { %v3248_v4 = vpop.f32.mrb[8].mxu0  ;;  %v734_v33 = vmax.f32 %v620_v22, 0.0 }
 0x108   : > { %v3828_v5 = vmax.f32 %v728_v0, %v735_v2  ;;  %v635_v6 = vadd.f32 %v3248_v4, %v3812_v54  ;;  %v629_v7 = vpop.f32.mrb[9].mxu0 }
 0x109   : > { %v630_v8 = vadd.f32 %v3812_v54, %v629_v7 }
 0x10a   : > { %v737_v11 = vmax.f32 %v635_v6, 0.0 }
 0x10b   : > { %v736_v14 = vmax.f32 %v630_v8, 0.0  ;;  %v3251_v15 = vpop.f32.mrb[10].mxu0 }
 0x10c   : > { %v3834_v16 = vmax.f32 %v730_v9, %v737_v11  ;;  %v645_v17 = vadd.f32 %v3251_v15, %v3812_v54  ;;  %v639_v18 = vpop.f32.mrb[11].mxu0 }
 0x10d   : > { %v3837_v19 = vmax.f32 %v729_v12, %v736_v14  ;;  %v640_v20 = vadd.f32 %v3812_v54, %v639_v18 }
 0x10e   : > { %v739_v23 = vmax.f32 %v645_v17, 0.0 }
 0x10f   : > { %v738_v26 = vmax.f32 %v640_v20, 0.0  ;;  %v3254_v27 = vpop.f32.mrb[12].mxu0 }
 0x110   : > { %v3842_v28 = vmax.f32 %v732_v21, %v739_v23  ;;  %v655_v29 = vadd.f32 %v3254_v27, %v3812_v54  ;;  %v649_v30 = vpop.f32.mrb[13].mxu0 }
 0x111   : > { %v3845_v31 = vmax.f32 %v731_v24, %v738_v26  ;;  %v650_v32 = vadd.f32 %v3812_v54, %v649_v30 }
 0x112   : > { %v741_v34 = vmax.f32 %v655_v29, 0.0 }
 0x113   : > { %v740_v36 = vmax.f32 %v650_v32, 0.0  ;;  %v3257_v37 = vpop.f32.mrb[14].mxu0 }
 0x114   : > { %v762_v38 = vmax.f32 %v734_v33, %v741_v34  ;;  %v659_v39 = vpop.f32.mrb[15].mxu0  ;;  %v665_v52 = vadd.f32 %v3257_v37, %v3812_v54 }
 0x115   : > { %v761_v40 = vmax.f32 %v733_v35, %v740_v36  ;;  %v660_v45 = vadd.f32 %v3812_v54, %v659_v39  ;;  %v779_v39 = vld [vmem:[%s4407_s3 + $0x10] sm:$0xff] }
 0x116   : > { %v743_v0 = vmax.f32 %v665_v52, 0.0  ;;  %v792_v52 = vld [vmem:[%s4407_s3 + $0x78] sm:$0xff] }
 0x117   : > { %v3260_v41 = vpop.f32.mrb[16].mxu0  ;;  %v742_v49 = vmax.f32 %v660_v45, 0.0  ;;  %v785_v45 = vld [vmem:[%s4407_s3 + $0x40] sm:$0xff] }
 0x118   : > { %v669_v42 = vpop.f32.mrb[17].mxu0  ;;  %v675_v1 = vadd.f32 %v3260_v41, %v3812_v54  ;;  %v781_v41 = vld [vmem:[%s4407_s3 + $0x20] sm:$0xff] }
 0x119   : > { %v670_v50 = vadd.f32 %v3812_v54, %v669_v42  ;;  %v782_v42 = vld [vmem:[%s4407_s3 + $0x28] sm:$0xff] }
 0x11a   : > { %v745_v14 = vmax.f32 %v675_v1, 0.0  ;;  %v803_v1 = vld [vmem:[%s4407_s3 + $0xd0] sm:$0xff] }
 0x11b   : > { %v3263_v43 = vpop.f32.mrb[18].mxu0  ;;  %v744_v59 = vmax.f32 %v670_v50, 0.0  ;;  %v790_v50 = vld [vmem:[%s4407_s3 + $0x68] sm:$0xff] }
 0x11c   : > { %v679_v44 = vpop.f32.mrb[19].mxu0 }
 0x11d   : > { %v680_v61 = vadd.f32 %v3812_v54, %v679_v44  ;;  %v784_v44 = vld [vmem:[%s4407_s3 + $0x38] sm:$0xff] }
 0x11f   : > { %v3266_v46 = vpop.f32.mrb[20].mxu0  ;;  %v746_v10 = vmax.f32 %v680_v61, 0.0  ;;  %v799_v61 = vld [vmem:[%s4407_s3 + $0xb0] sm:$0xff] }
 0x120   : > { %v695_v47 = vadd.f32 %v3266_v46, %v3812_v54  ;;  %v689_v48 = vpop.f32.mrb[21].mxu0  ;;  %v786_v46 = vld [vmem:[%s4407_s3 + $0x48] sm:$0xff] }
 0x121   : > { %v690_v11 = vadd.f32 %v3812_v54, %v689_v48  ;;  %v788_v48 = vld [vmem:[%s4407_s3 + $0x58] sm:$0xff] }
 0x122   : > { %v749_v51 = vmax.f32 %v695_v47, 0.0  ;;  %v787_v47 = vld [vmem:[%s4407_s3 + $0x50] sm:$0xff] }
 0x123   : > { %v3269_v53 = vpop.f32.mrb[22].mxu0  ;;  %v748_v26 = vmax.f32 %v690_v11, 0.0  ;;  %v812_v11 = vld [vmem:[%s4407_s3 + $0x118] sm:$0xff] }
 0x124   : > { %v763_v55 = vmax.f32 %v742_v49, %v749_v51  ;;  %v705_v56 = vadd.f32 %v3269_v53, %v3812_v54  ;;  %v699_v57 = vpop.f32.mrb[23].mxu0  ;;  %v789_v49 = vld [vmem:[%s4407_s3 + $0x60] sm:$0xff]  ;;  %v791_v51 = vld [vmem:[%s4407_s3 + $0x70] sm:$0xff] }
 0x125   : > { %v700_v58 = vadd.f32 %v3812_v54, %v699_v57  ;;  %v793_v53 = vld [vmem:[%s4407_s3 + $0x80] sm:$0xff]  ;;  %v796_v57 = vld [vmem:[%s4407_s3 + $0x98] sm:$0xff] }
 0x126   : > { %v751_v62 = vmax.f32 %v705_v56, 0.0  ;;  %v770_v63 = vmax.f32 %v3828_v5, %v763_v55  ;;  %v685_v5 = vadd.f32 %v3263_v43, %v3812_v54  ;;  %v783_v43 = vld [vmem:[%s4407_s3 + $0x30] sm:$0xff]  ;;  %v794_v55 = vld [vmem:[%s4407_s3 + $0x88] sm:$0xff] }
 0x127   : > { %v750_v2 = vmax.f32 %v700_v58, 0.0  ;;  %v3272_v3 = vpop.f32.mrb[24].mxu0  ;;  %v795_v56 = vld [vmem:[%s4407_s3 + $0x90] sm:$0xff]  ;;  %v797_v58 = vld [vmem:[%s4407_s3 + $0xa0] sm:$0xff] }
 0x128   : > { %v765_v4 = vmax.f32 %v744_v59, %v751_v62  ;;  %v715_v6 = vadd.f32 %v3272_v3, %v3812_v54  ;;  %v709_v7 = vpop.f32.mrb[25].mxu0  ;;  %v747_v29 = vmax.f32 %v685_v5, 0.0  ;;  %v798_v59 = vld [vmem:[%s4407_s3 + $0xa8] sm:$0xff]  ;;  %v800_v62 = vld [vmem:[%s4407_s3 + $0xb8] sm:$0xff]  ;;  %v805_v3 = vld [vmem:[%s4407_s3 + $0xe0] sm:$0xff] }
 0x129   : > { %v764_v8 = vmax.f32 %v743_v0, %v750_v2  ;;  %v710_v9 = vadd.f32 %v3812_v54, %v709_v7  ;;  %v802_v0 = vld [vmem:[%s4407_s3 + $0xc8] sm:$0xff]  ;;  %v804_v2 = vld [vmem:[%s4407_s3 + $0xd8] sm:$0xff]  ;;  %v1173_v5 = vld [vmem:[%s4408_s4 + $0x30] sm:$0xff] }
 0x12a   : > { %v772_v12 = vmax.f32 %v3834_v16, %v765_v4  ;;  %v753_v13 = vmax.f32 %v715_v6, 0.0  ;;  %v806_v4 = vld [vmem:[%s4407_s3 + $0xe8] sm:$0xff]  ;;  %v807_v6 = vld [vmem:[%s4407_s3 + $0xf0] sm:$0xff]  ;;  %v808_v7 = vld [vmem:[%s4407_s3 + $0xf8] sm:$0xff] }
 0x12b   : > { %v752_v15 = vmax.f32 %v710_v9, 0.0  ;;  %v3275_v17 = vpop.f32.mrb[26].mxu0  ;;  %v771_v18 = vmax.f32 %v3837_v19, %v764_v8  ;;  %v809_v8 = vld [vmem:[%s4407_s3 + $0x100] sm:$0xff]  ;;  %v810_v9 = vld [vmem:[%s4407_s3 + $0x108] sm:$0xff] }
 0x12c   : > { %v767_v20 = vmax.f32 %v746_v10, %v753_v13  ;;  %v725_v21 = vadd.f32 %v3275_v17, %v3812_v54  ;;  %v719_v22 = vpop.f32.mrb[27].mxu0  ;;  %v811_v10 = vld [vmem:[%s4407_s3 + $0x110] sm:$0xff]  ;;  %v1172_v13 = vld [vmem:[%s4408_s4 + $0x28] sm:$0xff] }
 0x12d   : > { %v766_v23 = vmax.f32 %v745_v14, %v752_v15  ;;  %v720_v24 = vadd.f32 %v3812_v54, %v719_v22  ;;  %v3474_v25 = vpack.c.bf16 %v771_v18, %v770_v63  ;;  %v1169_v54 = vld [vmem:[%s4408_s4 + $0x10] sm:$0xff]  ;;  %v801_v63 = vld [vmem:[%s4407_s3 + $0xc0] sm:$0xff]  ;;  %v1174_v15 = vld [vmem:[%s4408_s4 + $0x38] sm:$0xff] }
 0x12e   : > { %v774_v27 = vmax.f32 %v3842_v28, %v767_v20  ;;  %v755_v16 = vmax.f32 %v725_v21, 0.0  ;;  %v1170_v28 = vld [vmem:[%s4408_s4 + $0x18] sm:$0xff]  ;;  %v3498_v20 = vpack.c.bf16 %v1174_v15, %v1173_v5 }
 0x12f   : > { %v773_v30 = vmax.f32 %v3845_v31, %v766_v23  ;;  %v754_v32 = vmax.f32 %v720_v24, 0.0  ;;  %3475 = vmatprep.subr.bf16.mxu1 %v3474_v25  ;;  %v3486_v31 = vpack.c.bf16 %v1170_v28, %v1169_v54 }
 0x130   : > { %v769_v33 = vmax.f32 %v748_v26, %v755_v16  ;;  %3477 = vmatpush3.bf16.msra.mxu1 %v3474_v25  ;;  %v1176_v16 = vld [vmem:[%s4408_s4 + $0x48] sm:$0xff] }
 0x131   : > { %v768_v19 = vmax.f32 %v747_v29, %v754_v32  ;;  %v3478_v34 = vpack.c.bf16 %v773_v30, %v772_v12  ;;  %v1171_v12 = vld [vmem:[%s4408_s4 + $0x20] sm:$0xff] }
 0x132   : > { %v776_v35 = vmax.f32 %v762_v38, %v769_v33  ;;  %v778_v38 = vld [vmem:[%s4407_s3 + $0x8] sm:$0xff]  ;;  %v3494_v14 = vpack.c.bf16 %v1172_v13, %v1171_v12  ;;  %v2105_v12 = vld [vmem:[%s4410_s6 + $0x18] sm:$0xff]  ;;  %v2114_v13 = vld [vmem:[%s4410_s6 + $0x60] sm:$0xff] }
 0x133   : > { %v775_v36 = vmax.f32 %v761_v40, %v768_v19  ;;  %3479 = vmatprep.subr.bf16.mxu1 %v3478_v34  ;;  %v780_v40 = vld [vmem:[%s4407_s3 + $0x18] sm:$0xff]  ;;  %v1177_v19 = vld [vmem:[%s4408_s4 + $0x50] sm:$0xff] }
 0x134   : > { %3481 = vmatpush3.bf16.msra.mxu1 %v3478_v34  ;;  %3495 = vmatprep.subr.bf16.mxu0 %v3494_v14  ;;  %v1178_v34 = vld [vmem:[%s4408_s4 + $0x58] sm:$0xff] }
 0x135   : > { %v3482_v37 = vpack.c.bf16 %v775_v36, %v774_v27  ;;  %v1175_v27 = vld [vmem:[%s4408_s4 + $0x40] sm:$0xff] }
 0x136   : > { %v3502_v32 = vpack.c.bf16 %v1176_v16, %v1175_v27  ;;  %v2107_v27 = vld [vmem:[%s4410_s6 + $0x28] sm:$0xff]  ;;  %v2116_v16 = vld [vmem:[%s4410_s6 + $0x70] sm:$0xff] }
 0x137   : > { %3483 = vmatprep.subr.bf16.mxu1 %v3482_v37 }
 0x138   : > { %3485 = vmatpush3.bf16.msra.mxu1 %v3482_v37  ;;  %v3506_v37 = vpack.c.bf16 %v1178_v34, %v1177_v19 }
 0x139   : > { %3288 = vmatprep.subr.mxu1 %v776_v35 }
 0x13c   : > { %3289 = vmatpush3.msra.mxu1 %v776_v35 }
 0x13d   : > { %3291 = vmatmul.mubr.msk.f32.vlgmr.msra.gmra.mrb[0].mxu1 %vm813_vm4, %v778_v38  ;;  %3487 = vmatprep.subr.bf16.mxu1 %v3486_v31  ;;  %v1180_v38 = vld [vmem:[%s4408_s4 + $0x68] sm:$0xff] }
 0x13e   : > { %3293 = vmatprep.mubr.msk.f32.mxu1 %vm813_vm4, %v779_v39  ;;  %3489 = vmatpush3.bf16.msra.mxu1 %v3486_v31  ;;  %v1179_v31 = vld [vmem:[%s4408_s4 + $0x60] sm:$0xff] }
 0x13f   : > { %3574 = vmatprep.subr.bf16.mxu1 %v3821_v60 }
 0x141   : > { %3294 = vmatmul.mubr.msk.f32.gmra.mrb[2].mxu1 %vm813_vm4, %v780_v40 }
 0x142   : > { %3296 = vmatprep.mubr.msk.f32.mxu1 %vm813_vm4, %v781_v41  ;;  %v3510_v41 = vpack.c.bf16 %v1180_v38, %v1179_v31 }
 0x145   : > { %3297 = vmatmul.mubr.msk.f32.gmra.mrb[4].mxu1 %vm813_vm4, %v782_v42 }
 0x146   : > { %3299 = vmatprep.mubr.msk.f32.mxu1 %vm813_vm4, %v783_v43 }
 0x149   : > { %3300 = vmatmul.mubr.msk.f32.gmra.mrb[6].mxu1 %vm813_vm4, %v784_v44  ;;  %v1181_v44 = vld [vmem:[%s4408_s4 + $0x70] sm:$0xff] }
 0x14a   : > { %3302 = vmatprep.mubr.msk.f32.mxu1 %vm813_vm4, %v785_v45  ;;  %v1182_v45 = vld [vmem:[%s4408_s4 + $0x78] sm:$0xff] }
 0x14d   : > { %3303 = vmatmul.mubr.msk.f32.gmra.mrb[8].mxu1 %vm813_vm4, %v786_v46 }
 0x14e   : > { %3305 = vmatprep.mubr.msk.f32.mxu1 %vm813_vm4, %v787_v47 }
 0x151   : > { %3306 = vmatmul.mubr.msk.f32.gmra.mrb[10].mxu1 %vm813_vm4, %v788_v48  ;;  %v3514_v48 = vpack.c.bf16 %v1182_v45, %v1181_v44  ;;  %v2108_v45 = vld [vmem:[%s4410_s6 + $0x30] sm:$0xff] }
 0x152   : > { %3308 = vmatprep.mubr.msk.f32.mxu1 %vm813_vm4, %v789_v49 }
 0x155   : > { %3309 = vmatmul.mubr.msk.f32.gmra.mrb[12].mxu1 %vm813_vm4, %v790_v50 }
 0x156   : > { %3311 = vmatprep.mubr.msk.f32.mxu1 %vm813_vm4, %v791_v51  ;;  %v1183_v51 = vld [vmem:[%s4408_s4 + $0x80] sm:$0xff] }
 0x159   : > { %3312 = vmatmul.mubr.msk.f32.gmra.mrb[14].mxu1 %vm813_vm4, %v792_v52  ;;  %v1184_v52 = vld [vmem:[%s4408_s4 + $0x88] sm:$0xff] }
 0x15a   : > { %3314 = vmatprep.mubr.msk.f32.mxu1 %vm813_vm4, %v793_v53 }
 0x15d   : > { %3315 = vmatmul.mubr.msk.f32.gmra.mrb[16].mxu1 %vm813_vm4, %v794_v55 }
 0x15e   : > { %3317 = vmatprep.mubr.msk.f32.mxu1 %vm813_vm4, %v795_v56  ;;  %v3518_v56 = vpack.c.bf16 %v1184_v52, %v1183_v51  ;;  %v2739_v51 = vld [vmem:[%s4413_s9 + $0x8] sm:$0xff]  ;;  %v2741_v52 = vld [vmem:[%s4413_s9 + $0x18] sm:$0xff] }
 0x161   : > { %3318 = vmatmul.mubr.msk.f32.gmra.mrb[18].mxu1 %vm813_vm4, %v796_v57 }
 0x162   : > { %3320 = vmatprep.mubr.msk.f32.mxu1 %vm813_vm4, %v797_v58 }
 0x165   : > { %3321 = vmatmul.mubr.msk.f32.gmra.mrb[20].mxu1 %vm813_vm4, %v798_v59 }
 0x166   : > { %3323 = vmatprep.mubr.msk.f32.mxu1 %vm813_vm4, %v799_v61 }
 0x169   : > { %3324 = vmatmul.mubr.msk.f32.gmra.mrb[22].mxu1 %vm813_vm4, %v800_v62 }
 0x16a   : > { %3326 = vmatprep.mubr.msk.f32.mxu1 %vm813_vm4, %v801_v63 }
 0x16d   : > { %3327 = vmatmul.mubr.msk.f32.gmra.mrb[24].mxu1 %vm813_vm4, %v802_v0 }
 0x16e   : > { %3329 = vmatprep.mubr.msk.f32.mxu1 %vm813_vm4, %v803_v1 }
 0x171   : > { %3330 = vmatmul.mubr.msk.f32.gmra.mrb[26].mxu1 %vm813_vm4, %v804_v2 }
 0x172   : > { %3332 = vmatprep.mubr.msk.f32.mxu1 %vm813_vm4, %v805_v3 }
 0x175   : > { %3333 = vmatmul.mubr.msk.f32.gmra.mrb[28].mxu1 %vm813_vm4, %v806_v4  ;;  %v2103_v4 = vld [vmem:[%s4410_s6 + $0x8] sm:$0xff] }
 0x176   : > { %3335 = vmatprep.mubr.msk.f32.mxu1 %vm813_vm4, %v807_v6  ;;  %v2112_v6 = vld [vmem:[%s4410_s6 + $0x50] sm:$0xff] }
 0x179   : > { %3336 = vmatmul.mubr.msk.f32.gmra.mrb[30].mxu1 %vm813_vm4, %v808_v7  ;;  %v3522_v7 = vpack.c.bf16 %v2112_v6, %v2103_v4  ;;  %v2746_v4 = vld [vmem:[%s4413_s9 + $0x40] sm:$0xff]  ;;  %v2748_v6 = vld [vmem:[%s4413_s9 + $0x50] sm:$0xff] }
 0x17a   : > { %3338 = vmatprep.mubr.msk.f32.mxu1 %vm813_vm4, %v809_v8  ;;  %v2102_v8 = vld [vmem:[%s4410_s6] sm:$0xff] }
 0x17d   : > { %3339 = vmatmul.mubr.msk.f32.gmra.mrb[32].mxu1 %vm813_vm4, %v810_v9  ;;  %v2111_v9 = vld [vmem:[%s4410_s6 + $0x48] sm:$0xff] }
 0x17e   : > { %3341 = vmatprep.mubr.msk.f32.mxu1 %vm813_vm4, %v811_v10  ;;  %v3524_v10 = vpack.c.bf16 %v2111_v9, %v2102_v8  ;;  %v2751_v8 = vld [vmem:[%s4413_s9 + $0x68] sm:$0xff]  ;;  %v2753_v9 = vld [vmem:[%s4413_s9 + $0x78] sm:$0xff] }
 0x181   : > { %3342 = vmatmul.mubr.msk.f32.gmra.mrb[34].mxu1 %vm813_vm4, %v812_v11  ;;  %v3629_v11 = vmov 0.0  }
 0x210   : > { %v3292_v17 = vpop.f32.mrb[0].mxu1 }
 0x211   : > { %v988_v18 = vpop.f32.mrb[1].mxu1 }
 0x212   : > { %3358 = vmatprep.mubr.msk.f32.mxu0 %vm1185_vm5, %v988_v18 }
 0x213   : > { %3359 = vmatmul.mubr.msk.f32.vlgmr.msra.gmra.mrb[28].mxu0 %vm1185_vm5, %v3292_v17 }
 0x214   : > { %v3295_v21 = vpop.f32.mrb[2].mxu1  ;;  %3497 = vmatpush3.bf16.msra.mxu0 %v3494_v14  ;;  %v3526_v14 = vpack.c.bf16 %v2114_v13, %v2105_v12  ;;  %v2752_v12 = vld [vmem:[%s4413_s9 + $0x70] sm:$0xff] }
 0x215   : > { %v998_v22 = vpop.f32.mrb[3].mxu1  ;;  %3499 = vmatprep.subr.bf16.mxu0 %v3498_v20 }
 0x218   : > { %v3298_v23 = vpop.f32.mrb[4].mxu1 }
 0x219   : > { %v1008_v24 = vpop.f32.mrb[5].mxu1 }
 0x21a   : > { %3348 = vmatprep.mubr.msk.f32.mxu1 %vm1185_vm5, %v1008_v24 }
 0x21b   : > { %3349 = vmatmul.mubr.msk.f32.vlgmr.msra.gmra.mrb[36].mxu1 %vm1185_vm5, %v3298_v23 }
 0x21c   : > { %v3301_v25 = vpop.f32.mrb[6].mxu1  ;;  %3575 = vmatpush3.bf16.msra.mxu1 %v3821_v60 }
 0x21d   : > { %v1018_v26 = vpop.f32.mrb[7].mxu1  ;;  %3523 = vmatprep.subr.bf16.mxu1 %v3522_v7  ;;  %v3552_v7 = vpack.c.bf16 %v2748_v6, %v2746_v4 }
 0x21e   : > { %3351 = vmatprep.mubr.msk.f32.mxu1 %vm1185_vm5, %v1018_v26  ;;  %v2113_v26 = vld [vmem:[%s4410_s6 + $0x58] sm:$0xff] }
 0x21f   : > { %3352 = vmatmul.mubr.msk.f32.gmra.mrb[38].mxu1 %vm1185_vm5, %v3301_v25  ;;  %v2104_v25 = vld [vmem:[%s4410_s6 + $0x10] sm:$0xff] }
 0x220   : > { %v3304_v29 = vpop.f32.mrb[8].mxu1  ;;  %3361 = vmatprep.mubr.msk.f32.mxu1 %vm1185_vm5, %v998_v22  ;;  %v3038_v22 = vld [vmem:[%s4409_s5] ss:$0 sm:$0xff] }
 0x221   : > { %v1028_v30 = vpop.f32.mrb[9].mxu1 }
 0x222   : > { %3368 = vmatprep.mubr.msk.f32.mxu0 %vm1185_vm5, %v1028_v30 }
 0x223   : > { %3369 = vmatmul.mubr.msk.f32.vlgmr.msra.gmra.mrb[28].mxu0 %vm1185_vm5, %v3304_v29 }
 0x224   : > { %3501 = vmatpush3.bf16.msra.mxu0 %v3498_v20  ;;  %v3307_v60 = vpop.f32.mrb[10].mxu1 }
 0x225   : > { %v1038_v33 = vpop.f32.mrb[11].mxu1  ;;  %3503 = vmatprep.subr.bf16.mxu0 %v3502_v32 }
 0x226   : > { %3371 = vmatprep.mubr.msk.f32.mxu0 %vm1185_vm5, %v1038_v33  ;;  %v3528_v33 = vpack.c.bf16 %v2113_v26, %v2104_v25  ;;  %v2760_v25 = vld [vmem:[%s4413_s9 + $0xb0] sm:$0xff] }
 0x227   : > { %3362 = vmatmul.mubr.msk.f32.vlgmr.msra.gmra.mrb[38].mxu1 %vm1185_vm5, %v3295_v21  ;;  %3372 = vmatmul.mubr.msk.f32.gmra.mrb[30].mxu0 %vm1185_vm5, %v3307_v60 }
 0x228   : > { %v3310_v35 = vpop.f32.mrb[12].mxu1  ;;  %3525 = vmatpush1.bf16.msra.mxu1 %v3524_v10  ;;  %2196 = vmatprep.mubr.f32.mxu1 %v3629_v11  ;;  %v3554_v10 = vpack.c.bf16 %v2753_v9, %v2751_v8  ;;  %v2575_v8 = vld [vmem:[%s4411_s7 + $0x10] sm:$0xff]  ;;  %v2584_v9 = vld [vmem:[%s4411_s7 + $0x58] sm:$0xff] }
 0x229   : > { %v1048_v36 = vpop.f32.mrb[13].mxu1  ;;  %3527 = vmatprep.subr.bf16.mxu1 %v3526_v14  ;;  %v2755_v14 = vld [vmem:[%s4413_s9 + $0x88] sm:$0xff] }
 0x22a   : > { %3378 = vmatprep.mubr.msk.f32.mxu0 %vm1185_vm5, %v1048_v36  ;;  %v3530_v36 = vpack.c.bf16 %v2116_v16, %v2107_v27  ;;  %v2763_v27 = vld [vmem:[%s4413_s9 + $0xc8] sm:$0xff]  ;;  %v2765_v16 = vld [vmem:[%s4413_s9 + $0xd8] sm:$0xff] }
 0x22b   : > { %3379 = vmatmul.mubr.msk.f32.vlgmr.msra.gmra.mrb[28].mxu0 %vm1185_vm5, %v3310_v35 }
 0x22c   : > { %3505 = vmatpush3.bf16.msra.mxu0 %v3502_v32  ;;  %v3313_v54 = vpop.f32.mrb[14].mxu1 }
 0x22d   : > { %v1058_v28 = vpop.f32.mrb[15].mxu1  ;;  %3507 = vmatprep.subr.bf16.mxu0 %v3506_v37 }
 0x22e   : > { %3381 = vmatprep.mubr.msk.f32.mxu0 %vm1185_vm5, %v1058_v28 }
 0x22f   : > { %3382 = vmatmul.mubr.msk.f32.gmra.mrb[30].mxu0 %vm1185_vm5, %v3313_v54 }
 0x230   : > { %v3316_v39 = vpop.f32.mrb[16].mxu1 }
 0x231   : > { %v1068_v40 = vpop.f32.mrb[17].mxu1 }
 0x232   : > { %3388 = vmatprep.mubr.msk.f32.mxu0 %vm1185_vm5, %v1068_v40  ;;  %v2115_v40 = vld [vmem:[%s4410_s6 + $0x68] sm:$0xff] }
 0x233   : > { %3389 = vmatmul.mubr.msk.f32.vlgmr.msra.gmra.mrb[28].mxu0 %vm1185_vm5, %v3316_v39  ;;  %v2106_v39 = vld [vmem:[%s4410_s6 + $0x20] sm:$0xff] }
 0x234   : > { %3509 = vmatpush3.bf16.msra.mxu0 %v3506_v37  ;;  %v3319_v42 = vpop.f32.mrb[18].mxu1 }
 0x235   : > { %v1078_v43 = vpop.f32.mrb[19].mxu1  ;;  %3511 = vmatprep.subr.bf16.mxu0 %v3510_v41 }
 0x236   : > { %3391 = vmatprep.mubr.msk.f32.mxu0 %vm1185_vm5, %v1078_v43  ;;  %v3532_v43 = vpack.c.bf16 %v2115_v40, %v2106_v39  ;;  %v2574_v39 = vld [vmem:[%s4411_s7 + $0x8] sm:$0xff]  ;;  %v2583_v40 = vld [vmem:[%s4411_s7 + $0x50] sm:$0xff] }
 0x237   : > { %3392 = vmatmul.mubr.msk.f32.gmra.mrb[30].mxu0 %vm1185_vm5, %v3319_v42  ;;  %v2118_v42 = vld [vmem:[%s4410_s6 + $0x80] sm:$0xff] }
 0x238   : > { %v3322_v46 = vpop.f32.mrb[20].mxu1 }
 0x239   : > { %v1088_v47 = vpop.f32.mrb[21].mxu1 }
 0x23a   : > { %3398 = vmatprep.mubr.msk.f32.mxu0 %vm1185_vm5, %v1088_v47  ;;  %v2110_v47 = vld [vmem:[%s4410_s6 + $0x40] sm:$0xff] }
 0x23b   : > { %3399 = vmatmul.mubr.msk.f32.vlgmr.msra.gmra.mrb[28].mxu0 %vm1185_vm5, %v3322_v46  ;;  %v2117_v46 = vld [vmem:[%s4410_s6 + $0x78] sm:$0xff] }
 0x23c   : > { %3513 = vmatpush3.bf16.msra.mxu0 %v3510_v41  ;;  %v3325_v49 = vpop.f32.mrb[22].mxu1  ;;  %v2109_v41 = vld [vmem:[%s4410_s6 + $0x38] sm:$0xff] }
 0x23d   : > { %v1098_v50 = vpop.f32.mrb[23].mxu1  ;;  %3515 = vmatprep.subr.bf16.mxu0 %v3514_v48  ;;  %v3534_v44 = vpack.c.bf16 %v2118_v42, %v2109_v41 }
 0x23e   : > { %3401 = vmatprep.mubr.msk.f32.mxu0 %vm1185_vm5, %v1098_v50 }
 0x23f   : > { %3402 = vmatmul.mubr.msk.f32.gmra.mrb[30].mxu0 %vm1185_vm5, %v3325_v49  ;;  %v3536_v49 = vpack.c.bf16 %v2117_v46, %v2108_v45 }
 0x240   : > { %v3328_v53 = vpop.f32.mrb[24].mxu1 }
 0x241   : > { %v1108_v55 = vpop.f32.mrb[25].mxu1 }
 0x242   : > { %3408 = vmatprep.mubr.msk.f32.mxu0 %vm1185_vm5, %v1108_v55  ;;  %v2738_v55 = vld [vmem:[%s4413_s9] sm:$0xff] }
 0x243   : > { %3409 = vmatmul.mubr.msk.f32.vlgmr.msra.gmra.mrb[28].mxu0 %vm1185_vm5, %v3328_v53  ;;  %v3542_v53 = vpack.c.bf16 %v2741_v52, %v2739_v51 }
 0x244   : > { %3517 = vmatpush3.bf16.msra.mxu0 %v3514_v48  ;;  %v3331_v57 = vpop.f32.mrb[26].mxu1  ;;  %v2119_v48 = vld [vmem:[%s4410_s6 + $0x88] sm:$0xff] }
 0x245   : > { %v1118_v58 = vpop.f32.mrb[27].mxu1  ;;  %3519 = vmatprep.subr.bf16.mxu0 %v3518_v56  ;;  %v3538_v50 = vpack.c.bf16 %v2119_v48, %v2110_v47  ;;  %v2591_v47 = vld [vmem:[%s4411_s7 + $0x90] sm:$0xff] }
 0x246   : > { %3411 = vmatprep.mubr.msk.f32.mxu0 %vm1185_vm5, %v1118_v58  ;;  %v2743_v58 = vld [vmem:[%s4413_s9 + $0x28] sm:$0xff] }
 0x247   : > { %3412 = vmatmul.mubr.msk.f32.gmra.mrb[30].mxu0 %vm1185_vm5, %v3331_v57 }
 0x248   : > { %v3334_v59 = vpop.f32.mrb[28].mxu1 }
 0x249   : > { %v1128_v61 = vpop.f32.mrb[29].mxu1 }
 0x24a   : > { %3418 = vmatprep.mubr.msk.f32.mxu0 %vm1185_vm5, %v1128_v61 }
 0x24b   : > { %3419 = vmatmul.mubr.msk.f32.vlgmr.msra.gmra.mrb[28].mxu0 %vm1185_vm5, %v3334_v59  ;;  %v2745_v59 = vld [vmem:[%s4413_s9 + $0x38] sm:$0xff] }
 0x24c   : > { %3521 = vmatpush3.bf16.msra.mxu0 %v3518_v56  ;;  %v3337_v62 = vpop.f32.mrb[30].mxu1  ;;  %v2740_v56 = vld [vmem:[%s4413_s9 + $0x10] sm:$0xff]  ;;  %v3546_v61 = vpack.c.bf16 %v2745_v59, %v2743_v58  ;;  %v2601_v58 = vld [vmem:[%s4411_s7 + $0xe0] sm:$0xff] }
 0x24d   : > { %v1138_v63 = vpop.f32.mrb[31].mxu1  ;;  %v3544_v57 = vpack.c.bf16 %v2740_v56, %v2738_v55  ;;  %3543 = vmatprep.subr.bf16.mxu0 %v3542_v53  ;;  %v2600_v56 = vld [vmem:[%s4411_s7 + $0xd8] sm:$0xff] }
 0x24e   : > { %3421 = vmatprep.mubr.msk.f32.mxu0 %vm1185_vm5, %v1138_v63  ;;  %v2744_v63 = vld [vmem:[%s4413_s9 + $0x30] sm:$0xff] }
 0x24f   : > { %3422 = vmatmul.mubr.msk.f32.gmra.mrb[30].mxu0 %vm1185_vm5, %v3337_v62  ;;  %v2742_v62 = vld [vmem:[%s4413_s9 + $0x20] sm:$0xff] }
 0x250   : > { %v3340_v0 = vpop.f32.mrb[32].mxu1 }
 0x251   : > { %v1148_v1 = vpop.f32.mrb[33].mxu1 }
 0x252   : > { %3428 = vmatprep.mubr.msk.f32.mxu0 %vm1185_vm5, %v1148_v1  ;;  %v2747_v1 = vld [vmem:[%s4413_s9 + $0x48] sm:$0xff] }
 0x253   : > { %3429 = vmatmul.mubr.msk.f32.vlgmr.msra.gmra.mrb[28].mxu0 %vm1185_vm5, %v3340_v0  ;;  %v3548_v0 = vpack.c.bf16 %v2744_v63, %v2742_v62 }
 0x254   : > { %v3343_v2 = vpop.f32.mrb[34].mxu1  ;;  %3545 = vmatpush1.bf16.msra.mxu0 %v3544_v57 }
 0x255   : > { %v1158_v3 = vpop.f32.mrb[35].mxu1  ;;  %3547 = vmatprep.subr.bf16.mxu0 %v3546_v61 }
 0x256   : > { %3431 = vmatprep.mubr.msk.f32.mxu0 %vm1185_vm5, %v1158_v3 }
 0x257   : > { %3432 = vmatmul.mubr.msk.f32.gmra.mrb[30].mxu0 %vm1185_vm5, %v3343_v2  ;;  %v2749_v2 = vld [vmem:[%s4413_s9 + $0x58] sm:$0xff] }
 0x258   : > { %2846 = vmatprep.mubr.f32.mxu0 %v3629_v11  ;;  %3549 = vmatpush1.bf16.msra.mxu0 %v3548_v0  ;;  %v3550_v3 = vpack.c.bf16 %v2749_v2, %v2747_v1 }
 0x25a   : > { %3551 = vmatprep.subr.bf16.mxu0 %v3550_v3 }
 0x25c   : > { %3553 = vmatpush1.bf16.msra.mxu0 %v3552_v7 }
 0x25d   : > { %3555 = vmatprep.subr.bf16.mxu0 %v3554_v10 }
 0x2ee   : > { %v3350_v5 = vpop.f32.mrb[36].mxu1 }
 0x2ef   : > { %v1264_v15 = vpop.f32.mrb[37].mxu1 }
 0x2fa   : > { %v3363_v17 = vpop.f32.mrb[38].mxu1 }
 0x2fb   : > { %v1371_v18 = vpop.f32.mrb[39].mxu1 }
 0x326   : > { %v3430_v20 = vpop.f32.mrb[28].mxu0 }
 0x327   : > { %v3576_v21 = vadd.f32 %v3430_v20, %v3350_v5  ;;  %v2064_v23 = vpop.f32.mrb[29].mxu0  ;;  %v2757_v5 = vld [vmem:[%s4413_s9 + $0x98] sm:$0xff] }
 0x328   : > { %v3577_v24 = vadd.f32 %v2064_v23, %v1264_v15  ;;  %v3558_v15 = vpack.c.bf16 %v2757_v5, %v2755_v14 }
 0x329   : > { %v2095_v19 = vadd.f32 %v3576_v21, %v3038_v22  ;;  %v2759_v21 = vld [vmem:[%s4413_s9 + $0xa8] sm:$0xff] }
 0x32a   : > { %v2094_v29 = vadd.f32 %v3577_v24, %v3038_v22  ;;  %v3433_v30 = vpop.f32.mrb[30].mxu0  ;;  %v2758_v24 = vld [vmem:[%s4413_s9 + $0xa0] sm:$0xff] }
 0x32b   : > { %v3578_v32 = vadd.f32 %v3433_v30, %v3363_v17  ;;  %v2074_v60 = vpop.f32.mrb[31].mxu0  ;;  %v2099_v37 = vmax.f32 %v2095_v19, 0.0  ;;  %v2754_v17 = vld [vmem:[%s4413_s9 + $0x80] sm:$0xff]  ;;  %v3564_v26 = vpack.c.bf16 %v2760_v25, %v2758_v24  ;;  %v2769_v19 = vld [vmem:[%s4413_s9 + $0xf8] sm:$0xff] }
 0x32c   : > { %v2098_v34 = vmax.f32 %v2094_v29, 0.0  ;;  %v3579_v35 = vadd.f32 %v2074_v60, %v1371_v18  ;;  %v2756_v18 = vld [vmem:[%s4413_s9 + $0x90] sm:$0xff]  ;;  %v3566_v29 = vpack.c.bf16 %v2765_v16, %v2763_v27  ;;  %v2762_v30 = vld [vmem:[%s4413_s9 + $0xc0] sm:$0xff] }
 0x32d   : > { %v2097_v28 = vadd.f32 %v3578_v32, %v3038_v22  ;;  %v3560_v20 = vpack.c.bf16 %v2756_v18, %v2754_v17  ;;  %v2764_v32 = vld [vmem:[%s4413_s9 + $0xd0] sm:$0xff] }
 0x32e   : > { %3039 = vmatmul.mubr.msk.f32.vlgmr.msra.gmra.mrb[40].mxu1 %vm1185_vm5, %v2098_v34  ;;  %v2096_v54 = vadd.f32 %v3579_v35, %v3038_v22  ;;  %v2761_v22 = vld [vmem:[%s4413_s9 + $0xb8] sm:$0xff]  ;;  %v3568_v60 = vpack.c.bf16 %v2764_v32, %v2762_v30  ;;  %v2766_v35 = vld [vmem:[%s4413_s9 + $0xe0] sm:$0xff] }
 0x32f   : > { %3529 = vmatpush1.bf16.msra.mxu1 %v3528_v33  ;;  %2202 = vmatprep.mubr.f32.mxu1 %v3629_v11  ;;  %v2101_v38 = vmax.f32 %v2097_v28, 0.0  ;;  %v3562_v23 = vpack.c.bf16 %v2761_v22, %v2759_v21  ;;  %v2767_v33 = vld [vmem:[%s4413_s9 + $0xe8] sm:$0xff] }
 0x330   : > { %3531 = vmatprep.subr.bf16.mxu1 %v3530_v36  ;;  %v2100_v31 = vmax.f32 %v2096_v54, 0.0  ;;  %v2768_v36 = vld [vmem:[%s4413_s9 + $0xf0] sm:$0xff] }
 0x332   : > { %3040 = vmatmul.mubr.msk.f32.gmra.mrb[42].mxu1 %vm1185_vm5, %v2099_v37 }
 0x333   : > { %2208 = vmatprep.mubr.f32.mxu1 %v3629_v11 }
 0x336   : > { %3041 = vmatmul.mubr.msk.f32.gmra.mrb[44].mxu1 %vm1185_vm5, %v2100_v31 }
 0x337   : > { %2214 = vmatprep.mubr.f32.mxu1 %v3629_v11 }
 0x33a   : > { %3042 = vmatmul.mubr.msk.f32.gmra.mrb[46].mxu1 %vm1185_vm5, %v2101_v38 }
 0x33b   : > { %2285 = vmatprep.mubr.f32.mxu1 %v3629_v11 }
 0x33e   : > { %3043 = vmatmul.mubr.msk.f32.vlgmr.msra.gmra.mrb[48].mxu1 %vm1185_vm5, %v2098_v34 }
 0x33f   : > { %3533 = vmatpush1.bf16.msra.mxu1 %v3532_v43  ;;  %2291 = vmatprep.mubr.f32.mxu1 %v3629_v11 }
 0x340   : > { %3535 = vmatprep.subr.bf16.mxu1 %v3534_v44 }
 0x342   : > { %3044 = vmatmul.mubr.msk.f32.gmra.mrb[50].mxu1 %vm1185_vm5, %v2099_v37 }
 0x343   : > { %2297 = vmatprep.mubr.f32.mxu1 %v3629_v11 }
 0x346   : > { %3045 = vmatmul.mubr.msk.f32.gmra.mrb[52].mxu1 %vm1185_vm5, %v2100_v31 }
 0x347   : > { %2303 = vmatprep.mubr.f32.mxu1 %v3629_v11 }
 0x34a   : > { %3046 = vmatmul.mubr.msk.f32.gmra.mrb[54].mxu1 %vm1185_vm5, %v2101_v38 }
 0x34b   : > { %2374 = vmatprep.mubr.f32.mxu1 %v3629_v11 }
 0x34e   : > { %3047 = vmatmul.mubr.msk.f32.vlgmr.msra.gmra.mrb[56].mxu1 %vm1185_vm5, %v2098_v34 }
 0x34f   : > { %3537 = vmatpush1.bf16.msra.mxu1 %v3536_v49  ;;  %2380 = vmatprep.mubr.f32.mxu1 %v3629_v11  ;;  %v2592_v49 = vld [vmem:[%s4411_s7 + $0x98] sm:$0xff] }
 0x350   : > { %3539 = vmatprep.subr.bf16.mxu1 %v3538_v50 }
 0x352   : > { %3048 = vmatmul.mubr.msk.f32.gmra.mrb[58].mxu1 %vm1185_vm5, %v2099_v37 }
 0x353   : > { %2386 = vmatprep.mubr.f32.mxu1 %v3629_v11 }
 0x356   : > { %3049 = vmatmul.mubr.msk.f32.gmra.mrb[60].mxu1 %vm1185_vm5, %v2100_v31 }
 0x357   : > { %2392 = vmatprep.mubr.f32.mxu1 %v3629_v11 }
 0x35a   : > { %3050 = vmatmul.mubr.msk.f32.gmra.mrb[62].mxu1 %vm1185_vm5, %v2101_v38 }
 0x35b   : > { %2463 = vmatprep.mubr.f32.mxu1 %v3629_v11 }
 0x35e   : > { %3051 = vmatmul.mubr.msk.f32.vlgmr.msra.gmra.mrb[64].mxu1 %vm1185_vm5, %v2098_v34 }
 0x35f   : > { %3541 = vmatpush3.bf16.msra.mxu1 %v3538_v50  ;;  %2469 = vmatprep.mubr.f32.mxu1 %v3629_v11 }
 0x362   : > { %3052 = vmatmul.mubr.msk.f32.gmra.mrb[66].mxu1 %vm1185_vm5, %v2099_v37 }
 0x363   : > { %2475 = vmatprep.mubr.f32.mxu1 %v3629_v11 }
 0x366   : > { %3053 = vmatmul.mubr.msk.f32.gmra.mrb[68].mxu1 %vm1185_vm5, %v2100_v31 }
 0x367   : > { %2481 = vmatprep.mubr.f32.mxu1 %v3629_v11  ;;  %v2750_v11 = vld [vmem:[%s4413_s9 + $0x60] sm:$0xff] }
 0x368   : > { %v3556_v13 = vpack.c.bf16 %v2752_v12, %v2750_v11  ;;  %v2576_v11 = vld [vmem:[%s4411_s7 + $0x18] sm:$0xff]  ;;  %v2585_v12 = vld [vmem:[%s4411_s7 + $0x60] sm:$0xff] }
 0x36a   : > { %3054 = vmatmul.mubr.msk.f32.gmra.mrb[70].mxu1 %vm1185_vm5, %v2101_v38  ;;  %3557 = vmatpush1.bf16.msra.mxu0 %v3556_v13 }
 0x36b   : > { %3438 = vmatprep.mubr.msk.f32.mxu1 %vm1185_vm5, %v2098_v34  ;;  %3559 = vmatprep.subr.bf16.mxu0 %v3558_v15  ;;  %v3570_v34 = vpack.c.bf16 %v2769_v19, %v2767_v33 }
 0x36e   : > { %3439 = vmatmul.mubr.msk.f32.vlgmr.msra.gmra.mrb[72].mxu1 %vm1185_vm5, %v2099_v37  ;;  %3561 = vmatpush1.bf16.msra.mxu0 %v3560_v20  ;;  %v3572_v37 = vpack.c.bf16 %v2768_v36, %v2766_v35 }
 0x36f   : > { %3441 = vmatprep.mubr.msk.f32.mxu1 %vm1185_vm5, %v2100_v31  ;;  %3563 = vmatprep.subr.bf16.mxu0 %v3562_v23  ;;  %v2573_v31 = vld [vmem:[%s4411_s7] sm:$0xff] }
 0x370   : > { %v2593_v23 = vld [vmem:[%s4411_s7 + $0xa0] sm:$0xff] }
 0x372   : > { %3442 = vmatmul.mubr.msk.f32.gmra.mrb[74].mxu1 %vm1185_vm5, %v2101_v38  ;;  %3565 = vmatpush1.bf16.msra.mxu0 %v3564_v26  ;;  %v2582_v38 = vld [vmem:[%s4411_s7 + $0x48] sm:$0xff] }
 0x373   : > { %3567 = vmatprep.subr.bf16.mxu0 %v3566_v29  ;;  %v2594_v26 = vld [vmem:[%s4411_s7 + $0xa8] sm:$0xff] }
 0x376   : > { %3569 = vmatpush1.bf16.msra.mxu0 %v3568_v60 }
 0x377   : > { %3571 = vmatprep.subr.bf16.mxu0 %v3570_v34  ;;  %v2602_v34 = vld [vmem:[%s4411_s7 + $0xe8] sm:$0xff] }
 0x37a   : > { %3573 = vmatpush1.bf16.msra.mxu0 %v3572_v37  ;;  %v2603_v37 = vld [vmem:[%s4411_s7 + $0xf0] sm:$0xff] }
 0x401   : > { %v2198_v54 = vpop.f32.mrb[40].mxu1 }
 0x402   : > { %v2200_v28 = vpop.f32.mrb[41].mxu1  ;;  %v2609_v42 = vmul.f32 %v2573_v31, %v2198_v54 }
 0x403   : > { %v2623_v45 = vmul.f32 %v2574_v39, %v2200_v28 }
 0x405   : > { %v2204_v41 = vpop.f32.mrb[42].mxu1 }
 0x406   : > { %v2610_v43 = vmul.f32 %v2582_v38, %v2204_v41  ;;  %v2206_v44 = vpop.f32.mrb[43].mxu1 }
 0x407   : > { %v2624_v46 = vmul.f32 %v2583_v40, %v2206_v44 }
 0x408   : > { %v2613_v48 = vadd.f32 %v2610_v43, %v2609_v42 }
 0x409   : > { %v2627_v50 = vadd.f32 %v2624_v46, %v2623_v45  ;;  %v2210_v51 = vpop.f32.mrb[44].mxu1 }
 0x40a   : > { %v2611_v52 = vmul.f32 %v2591_v47, %v2210_v51  ;;  %v2212_v53 = vpop.f32.mrb[45].mxu1  ;;  %v2578_v51 = vld [vmem:[%s4411_s7 + $0x28] sm:$0xff] }
 0x40b   : > { %v2625_v55 = vmul.f32 %v2592_v49, %v2212_v53  ;;  %v2586_v49 = vld [vmem:[%s4411_s7 + $0x68] sm:$0xff] }
 0x40c   : > { %v2614_v57 = vadd.f32 %v2613_v48, %v2611_v52  ;;  %v2577_v48 = vld [vmem:[%s4411_s7 + $0x20] sm:$0xff]  ;;  %v2587_v52 = vld [vmem:[%s4411_s7 + $0x70] sm:$0xff] }
 0x40d   : > { %v2628_v59 = vadd.f32 %v2627_v50, %v2625_v55  ;;  %v2216_v61 = vpop.f32.mrb[46].mxu1 }
 0x40e   : > { %v2612_v62 = vmul.f32 %v2600_v56, %v2216_v61  ;;  %v2218_v63 = vpop.f32.mrb[47].mxu1 }
 0x40f   : > { %v2626_v0 = vmul.f32 %v2601_v58, %v2218_v63 }
 0x410   : > { %v2615_v1 = vadd.f32 %v2614_v57, %v2612_v62 }
 0x411   : > { %v2629_v2 = vadd.f32 %v2628_v59, %v2626_v0  ;;  %v2287_v3 = vpop.f32.mrb[48].mxu1  ;;  %v2595_v0 = vld [vmem:[%s4411_s7 + $0xb0] sm:$0xff] }
 0x412   : > { %v2616_v4 = vrot.slane %v2615_v1, 4  ;;  %v2289_v6 = vpop.f32.mrb[49].mxu1  ;;  %v2637_v15 = vmul.f32 %v2575_v8, %v2287_v3  ;;  %v2596_v3 = vld [vmem:[%s4411_s7 + $0xb8] sm:$0xff] }
 0x413   : > { %v2630_v7 = vrot.slane %v2629_v2, 4  ;;  %v2651_v21 = vmul.f32 %v2576_v11, %v2289_v6 }
 0x414   : > { %v2617_v10 = vadd.f32 %v2616_v4, %v2615_v1 }
 0x415   : > { %v2631_v13 = vadd.f32 %v2630_v7, %v2629_v2  ;;  %v2293_v14 = vpop.f32.mrb[50].mxu1 }
 0x416   : > { %v2618_v5 = vrot.slane %v2617_v10, 2  ;;  %v2638_v17 = vmul.f32 %v2584_v9, %v2293_v14  ;;  %v2295_v18 = vpop.f32.mrb[51].mxu1 }
 0x417   : > { %v2632_v20 = vrot.slane %v2631_v13, 2  ;;  %v2652_v22 = vmul.f32 %v2585_v12, %v2295_v18 }
 0x418   : > { %v2619_v24 = vadd.f32 %v2618_v5, %v2617_v10  ;;  %v2641_v25 = vadd.f32 %v2638_v17, %v2637_v15  ;;  %v2605_v15 = vld [vmem:[%s4411_s7 + $0x100] sm:$0xff] }
 0x419   : > { %v2633_v27 = vadd.f32 %v2632_v20, %v2631_v13  ;;  %v2655_v16 = vadd.f32 %v2652_v22, %v2651_v21  ;;  %v2299_v29 = vpop.f32.mrb[52].mxu1  ;;  %v2604_v13 = vld [vmem:[%s4411_s7 + $0xf8] sm:$0xff] }
 0x41a   : > { %v2620_v30 = vrot.slane %v2619_v24, 1  ;;  %v2639_v32 = vmul.f32 %v2593_v23, %v2299_v29  ;;  %v2301_v60 = vpop.f32.mrb[53].mxu1 }
 0x41b   : > { %v2634_v33 = vrot.slane %v2633_v27, 1  ;;  %v2653_v19 = vmul.f32 %v2594_v26, %v2301_v60  ;;  %v2579_v60 = vld [vmem:[%s4411_s7 + $0x30] sm:$0xff] }
 0x41c   : > { %v2621_v35 = vadd.f32 %v2620_v30, %v2619_v24  ;;  %v2642_v36 = vadd.f32 %v2641_v25, %v2639_v32 }
 0x41d   : > { %v2635_v54 = vadd.f32 %v2634_v33, %v2633_v27  ;;  %v2656_v28 = vadd.f32 %v2655_v16, %v2653_v19  ;;  %v2305_v31 = vpop.f32.mrb[54].mxu1  ;;  %v2588_v33 = vld [vmem:[%s4411_s7 + $0x78] sm:$0xff] }
 0x41e   : > { %v2640_v38 = vmul.f32 %v2602_v34, %v2305_v31  ;;  %v2307_v39 = vpop.f32.mrb[55].mxu1  ;;  %v2580_v34 = vld [vmem:[%s4411_s7 + $0x38] sm:$0xff] }
 0x41f   : > { %v2636_v40 = vadd.f32 %v2635_v54, %v2621_v35  ;;  %v2654_v41 = vmul.f32 %v2603_v37, %v2307_v39  ;;  %v2589_v35 = vld [vmem:[%s4411_s7 + $0x80] sm:$0xff] }
 0x420   : > { %v2643_v42 = vadd.f32 %v2642_v36, %v2640_v38 }
 0x421   : > { %v2657_v43 = vadd.f32 %v2656_v28, %v2654_v41  ;;  %v2376_v44 = vpop.f32.mrb[56].mxu1 }
 0x422   : > { %v2644_v45 = vrot.slane %v2643_v42, 4  ;;  %v2378_v46 = vpop.f32.mrb[57].mxu1  ;;  %v2665_v57 = vmul.f32 %v2577_v48, %v2376_v44 }
 0x423   : > { %v2658_v47 = vrot.slane %v2657_v43, 4  ;;  %v2679_v62 = vmul.f32 %v2578_v51, %v2378_v46 }
 0x424   : > { %v2645_v50 = vadd.f32 %v2644_v45, %v2643_v42  ;;  %v2597_v42 = vld [vmem:[%s4411_s7 + $0xc0] sm:$0xff]  ;;  %v2598_v45 = vld [vmem:[%s4411_s7 + $0xc8] sm:$0xff] }
 0x425   : > { %v2659_v53 = vadd.f32 %v2658_v47, %v2657_v43  ;;  %v2382_v55 = vpop.f32.mrb[58].mxu1 }
 0x426   : > { %v2646_v56 = vrot.slane %v2645_v50, 2  ;;  %v2666_v58 = vmul.f32 %v2586_v49, %v2382_v55  ;;  %v2384_v59 = vpop.f32.mrb[59].mxu1  ;;  %v2606_v55 = vld [vmem:[%s4411_s7 + $0x108] sm:$0xff] }
 0x427   : > { %v2660_v61 = vrot.slane %v2659_v53, 2  ;;  %v2680_v63 = vmul.f32 %v2587_v52, %v2384_v59 }
 0x428   : > { %v2647_v1 = vadd.f32 %v2646_v56, %v2645_v50  ;;  %v2669_v2 = vadd.f32 %v2666_v58, %v2665_v57  ;;  %v2607_v58 = vld [vmem:[%s4411_s7 + $0x110] sm:$0xff] }
 0x429   : > { %v2661_v4 = vadd.f32 %v2660_v61, %v2659_v53  ;;  %v2683_v6 = vadd.f32 %v2680_v63, %v2679_v62  ;;  %v2388_v7 = vpop.f32.mrb[60].mxu1 }
 0x42a   : > { %v2648_v8 = vrot.slane %v2647_v1, 1  ;;  %v2667_v9 = vmul.f32 %v2595_v0, %v2388_v7  ;;  %v2390_v10 = vpop.f32.mrb[61].mxu1  ;;  %v2581_v7 = vld [vmem:[%s4411_s7 + $0x40] sm:$0xff] }
 0x42b   : > { %v2662_v11 = vrot.slane %v2661_v4, 1  ;;  %v2681_v12 = vmul.f32 %v2596_v3, %v2390_v10  ;;  %v2590_v3 = vld [vmem:[%s4411_s7 + $0x88] sm:$0xff] }
 0x42c   : > { %v2649_v14 = vadd.f32 %v2648_v8, %v2647_v1  ;;  %v2670_v5 = vadd.f32 %v2669_v2, %v2667_v9 }
 0x42d   : > { %v2663_v17 = vadd.f32 %v2662_v11, %v2661_v4  ;;  %v2684_v18 = vadd.f32 %v2683_v6, %v2681_v12  ;;  %v2394_v20 = vpop.f32.mrb[62].mxu1 }
 0x42e   : > { %v2650_v21 = vadd.f32 %v2649_v14, %v2636_v40  ;;  %v2668_v22 = vmul.f32 %v2604_v13, %v2394_v20  ;;  %v2396_v23 = vpop.f32.mrb[63].mxu1 }
 0x42f   : > { %v2682_v24 = vmul.f32 %v2605_v15, %v2396_v23  ;;  %v2599_v15 = vld [vmem:[%s4411_s7 + $0xd0] sm:$0xff] }
 0x430   : > { %v2664_v25 = vadd.f32 %v2663_v17, %v2650_v21  ;;  %v2671_v26 = vadd.f32 %v2670_v5, %v2668_v22  ;;  %v2608_v22 = vld [vmem:[%s4411_s7 + $0x118] sm:$0xff] }
 0x431   : > { %v2685_v27 = vadd.f32 %v2684_v18, %v2682_v24  ;;  %v2465_v16 = vpop.f32.mrb[64].mxu1 }
 0x432   : > { %v2672_v29 = vrot.slane %v2671_v26, 4  ;;  %v2467_v30 = vpop.f32.mrb[65].mxu1  ;;  %v2693_v28 = vmul.f32 %v2579_v60, %v2465_v16 }
 0x433   : > { %v2686_v32 = vrot.slane %v2685_v27, 4  ;;  %v2707_v40 = vmul.f32 %v2580_v34, %v2467_v30 }
 0x434   : > { %v2673_v19 = vadd.f32 %v2672_v29, %v2671_v26 }
 0x435   : > { %v2687_v36 = vadd.f32 %v2686_v32, %v2685_v27  ;;  %v2471_v37 = vpop.f32.mrb[66].mxu1 }
 0x436   : > { %v2674_v54 = vrot.slane %v2673_v19, 2  ;;  %v2694_v31 = vmul.f32 %v2588_v33, %v2471_v37  ;;  %v2473_v38 = vpop.f32.mrb[67].mxu1 }
 0x437   : > { %v2688_v39 = vrot.slane %v2687_v36, 2  ;;  %v2708_v41 = vmul.f32 %v2589_v35, %v2473_v38 }
 0x438   : > { %v2675_v43 = vadd.f32 %v2674_v54, %v2673_v19  ;;  %v2697_v44 = vadd.f32 %v2694_v31, %v2693_v28 }
 0x439   : > { %v2689_v46 = vadd.f32 %v2688_v39, %v2687_v36  ;;  %v2711_v47 = vadd.f32 %v2708_v41, %v2707_v40  ;;  %v2477_v48 = vpop.f32.mrb[68].mxu1  ;;  %v2735_v39 = vld [vmem:[%s4412_s8] sm:$0x1] }
 0x43a   : > { %v2676_v49 = vrot.slane %v2675_v43, 1  ;;  %v2695_v50 = vmul.f32 %v2597_v42, %v2477_v48  ;;  %v2479_v51 = vpop.f32.mrb[69].mxu1  ;;  %v3630_v48 = vmov 1966171168  }
 0x43b   : > { %v2690_v52 = vrot.slane %v2689_v46, 1  ;;  %v2709_v53 = vmul.f32 %v2598_v45, %v2479_v51 }
 0x43c   : > { %v2677_v56 = vadd.f32 %v2676_v49, %v2675_v43  ;;  %v2698_v57 = vadd.f32 %v2697_v44, %v2695_v50  ;;  %v2772_v43 = vlaneseq  ;;  %v2857_v49 = vunpack.c.l.s4 %v3630_v48 }
 0x43d   : > { %v2691_v59 = vadd.f32 %v2690_v52, %v2689_v46  ;;  %v2712_v61 = vadd.f32 %v2711_v47, %v2709_v53  ;;  %v2483_v62 = vpop.f32.mrb[70].mxu1  ;;  %v2770_v46 = vld [vmem:[%s4414_s10] sm:$0x3] }
 0x43e   : > { %v2678_v63 = vadd.f32 %v2677_v56, %v2664_v25  ;;  %v2696_v0 = vmul.f32 %v2606_v55, %v2483_v62  ;;  %v2485_v1 = vpop.f32.mrb[71].mxu1  ;;  %v2773_v44 = vshrl.u32 %v2772_v43, 7  ;;  %v2858_v52 = vunpack.c.0.s8 %v2857_v49 }
 0x43f   : > { %v2710_v2 = vmul.f32 %v2607_v58, %v2485_v1  ;;  %vm2873_vm6 = vcmp.lt.s32.totalorder %v2772_v43, 256 }
 0x440   : > { %v2692_v4 = vadd.f32 %v2691_v59, %v2678_v63  ;;  %v2699_v6 = vadd.f32 %v2698_v57, %v2696_v0  ;;  %v2774_v45 = vsub.s32 0, %v2773_v44  ;;  %v2778_v47 = vsub.s32 1, %v2773_v44 }
 0x441   : > { %v2713_v8 = vadd.f32 %v2712_v61, %v2710_v2  ;;  %v3440_v9 = vpop.f32.mrb[72].mxu1  ;;  %v2861_v58 = vsub.s32 %v2858_v52, %v2773_v44 }
 0x442   : > { %v2700_v10 = vrot.slane %v2699_v6, 4  ;;  %v2722_v11 = vmul.f32 %v3440_v9, %v2590_v3  ;;  %v2554_v12 = vpop.f32.mrb[73].mxu1  ;;  %v2775_v50 = vrot.slane %v2770_v46, %v2774_v45  ;;  %v2779_v51 = vrot.slane %v2770_v46, %v2778_v47 }
 0x443   : > { %v2714_v13 = vrot.slane %v2713_v8, 4  ;;  %v2721_v14 = vmul.f32 %v2581_v7, %v2554_v12 }
 0x444   : > { %v2701_v5 = vadd.f32 %v2700_v10, %v2699_v6 }
 0x445   : > { %v2715_v17 = vadd.f32 %v2714_v13, %v2713_v8  ;;  %v2725_v18 = vadd.f32 %v2722_v11, %v2721_v14  ;;  %v3443_v20 = vpop.f32.mrb[74].mxu1 }
 0x446   : > { %v2702_v21 = vrot.slane %v2701_v5, 2  ;;  %v2564_v23 = vpop.f32.mrb[75].mxu1  ;;  %v2724_v16 = vmul.f32 %v3443_v20, %v2608_v22 }
 0x447   : > { %v2716_v24 = vrot.slane %v2715_v17, 2  ;;  %v2723_v25 = vmul.f32 %v2599_v15, %v2564_v23 }
 0x448   : > { %v2703_v26 = vadd.f32 %v2702_v21, %v2701_v5 }
 0x449   : > { %v2717_v27 = vadd.f32 %v2716_v24, %v2715_v17  ;;  %v2726_v29 = vadd.f32 %v2725_v18, %v2723_v25 }
 0x44a   : > { %v2704_v30 = vrot.slane %v2703_v26, 1 }
 0x44b   : > { %v2718_v32 = vrot.slane %v2717_v27, 1  ;;  %v2727_v60 = vadd.f32 %v2726_v29, %v2724_v16 }
 0x44c   : > { %v2705_v33 = vadd.f32 %v2704_v30, %v2703_v26 }
 0x44d   : > { %v2719_v19 = vadd.f32 %v2718_v32, %v2717_v27  ;;  %v2728_v34 = vrot.slane %v2727_v60, 4 }
 0x44e   : > { %v2706_v35 = vadd.f32 %v2705_v33, %v2692_v4 }
 0x44f   : > { %v2729_v36 = vadd.f32 %v2728_v34, %v2727_v60 }
 0x450   : > { %v2720_v37 = vadd.f32 %v2719_v19, %v2706_v35 }
 0x451   : > { %v2730_v54 = vrot.slane %v2729_v36, 2 }
 0x453   : > { %v2731_v28 = vadd.f32 %v2730_v54, %v2729_v36 }
 0x455   : > { %v2732_v31 = vrot.slane %v2731_v28, 1 }
 0x457   : > { %v2733_v38 = vadd.f32 %v2732_v31, %v2731_v28 }
 0x459   : > { %v2734_v40 = vadd.f32 %v2733_v38, %v2720_v37 }
 0x45b   : > { %v2736_v41 = vadd.f32 %v2735_v39, %v2734_v40 }
 0x45d   : > { %v2737_v42 = vmax.f32 %v2736_v41, 0.0 }
 0x45f   : > { %2847 = vmatmul.mubr.f32.vlgmr.msra.gmra.mrb[32].mxu0 %v2737_v42 }
 0x532   : > { %v2848_v53 = vpop.f32.mrb[32].mxu0 }
 0x533   : > { %v2849_v55 = vadd.f32 %v2848_v53, %v2775_v50  ;;  %v2850_v56 = vpop.f32.mrb[33].mxu0 }
 0x534   : > { %v2851_v57 = vadd.f32 %v2850_v56, %v2779_v51 }
 0x536   : > { %v2855_v59 = vcombine.low %v2849_v55, %v2851_v57 }
 0x538   : > { %v2862_v61 = vrot.slane %v2855_v59, %v2861_v58 }
 0x53a   : > { %v2869_v62 = vrot.slane %v2862_v61, %v2861_v58 }
 0x53c   : > { %2875 = vst.msk [vmem:[%s384_s19] sm:$0x3] %vm2873_vm6, %v2869_v62 }
 0x53d PF: > { %s21_s17 = sadd.s32 1, %s3626_s17  }
 0x53e   : > { %p18_p4 = scmp.ge.s32.totalorder %s21_s17, 4  }
 0x540   :  { %20 = sbr.rel (!%p18_p4) target bundleno = 1 (0x1), region = 94 }

</bundles_post_ra>
